<compile_context>
chip_gen: v7x
topology: tpu7x:2x2x1
jax: 0.10.0
libtpu: 0.0.40
codegen_flags: <defaults>
</compile_context>

<pallas_src>
import functools
import math

import jax
import jax.numpy as jnp
from jax.experimental import pallas as pl
from jax.experimental.pallas import tpu as pltpu


def _aspp_kernel(*refs, k_h, k_w, dilation, h_tile, w_out, halo):
    """One (batch, h-tile) output block: atrous-conv taps -> +bias -> ReLU.

    refs (halo > 0):  a_ref, b_ref, w_ref, bias_ref, o_ref, win_ref, acc_ref
    refs (halo == 0): a_ref,        w_ref, bias_ref, o_ref, win_ref, acc_ref

      a_ref:    (1, h_tile, Wp, C1)    main rows of this tile's input window
      b_ref:    (1, halo,  Wp, C1)     halo rows just below the tile
      w_ref:    (Kh*Kw, C1, C2)        conv weight with BN scale folded in (resident)
      bias_ref: (1, C2) f32            beta - running_mean * scale (resident)
      o_ref:    (1, h_tile, w_out, C2)
      win_ref:  (h_tile+halo, Wp, C1)  scratch: assembled input window
      acc_ref:  (h_tile*w_out, C2) f32 scratch accumulator
    """
    if halo > 0:
        a_ref, b_ref, w_ref, bias_ref, o_ref, win_ref, acc_ref = refs
    else:
        a_ref, w_ref, bias_ref, o_ref, win_ref, acc_ref = refs

    c1 = a_ref.shape[-1]
    c2 = o_ref.shape[-1]
    rows = h_tile * w_out

    # Assemble the (h_tile + halo)-row window in VMEM scratch (leading-dim stores only).
    win_ref[0:h_tile] = a_ref[0]
    if halo > 0:
        win_ref[h_tile:h_tile + halo] = b_ref[0]

    first = True
    for kw in range(k_w):
        ow = kw * dilation
        # One sublane-realigning W-offset slice per kw, flattened once to (rows_win, C1).
        xw = win_ref[:, ow:ow + w_out, :]                     # (h_tile+halo, w_out, C1)
        xw = xw.reshape((h_tile + halo) * w_out, c1)
        for kh in range(k_h):
            off = kh * dilation * w_out                       # contiguous row offset
            patch = xw[off:off + rows]                        # (rows, C1) -- cheap slice
            contrib = jnp.dot(patch, w_ref[kh * k_w + kw],
                              preferred_element_type=jnp.float32)
            if first:
                acc_ref[...] = contrib
                first = False
            else:
                acc_ref[...] += contrib

    # Folded-BN bias + ReLU epilogue (per output channel = lane dim), cast once on store.
    y = jnp.maximum(acc_ref[...] + bias_ref[0].astype(jnp.float32), 0.0)
    o_ref[0] = y.reshape(h_tile, w_out, c2).astype(o_ref.dtype)


def _vmem_capacity_bytes():
    try:
        return int(pltpu.get_tpu_info().vmem_capacity_bytes)
    except Exception:
        return 64 << 20            # conservative: v7x per-TensorCore VMEM


def aspp_forward(x, conv_weight, bn_gamma, bn_beta, bn_mean, bn_var, *,
                 padding, dilation, eps=1e-5,
                 compute_dtype=jnp.bfloat16, h_tile=None):
    """ReLU(BN(atrous_conv(x))) for NCHW `x` and nn.Conv2d-layout weights.

    x:           (N, C1, H, W)
    conv_weight: (C2, C1, Kh, Kw)   (bias=False)
    Returns (N, C2, H_out, W_out) in x.dtype.
    """
    n, c1, h, w = x.shape
    c2, c1_w, k_h, k_w = conv_weight.shape
    assert c1 == c1_w, "channel mismatch between input and conv weight"

    h_out = h + 2 * padding - dilation * (k_h - 1)
    w_out = w + 2 * padding - dilation * (k_w - 1)
    assert h_out > 0 and w_out > 0
    halo_h = dilation * (k_h - 1)          # extra rows a tile's window needs below it
    halo_w = dilation * (k_w - 1)
    wp = w_out + halo_w                    # = w + 2*padding
    taps = k_h * k_w

    out_dtype = x.dtype
    cs = jnp.dtype(compute_dtype).itemsize
    os_ = jnp.dtype(out_dtype).itemsize

    # ---- VMEM budget & H-tile selection --------------------------------------------
    capacity = _vmem_capacity_bytes()
    budget = int(0.8 * capacity)           # headroom so double-buffering survives

    def _round_tile(t):
        if halo_h > 0:                     # blocked halo view needs halo | h_tile
            t = max(halo_h, (t // halo_h) * halo_h)
            t = min(t, pl.cdiv(h_out, halo_h) * halo_h)
        else:
            t = max(1, min(t, h_out))
        return int(t)

    if h_tile is None:
        per_row = (3 * wp * c1 * cs            # 2x buffered input rows + window scratch
                   + 2 * w_out * c2 * os_      # 2x buffered output rows
                   + w_out * c2 * 4)           # f32 accumulator row
        fixed = (3 * halo_h * wp * c1 * cs     # 2x halo view + halo rows of window
                 + 2 * taps * c1 * c2 * cs     # 2x buffered (resident) weight
                 + 2 * c2 * 4                  # bias
                 + (2 << 20))                  # Mosaic internal headroom
        h_tile = _round_tile(max(1, (budget - fixed) // max(per_row, 1)))
    else:
        h_tile = _round_tile(h_tile)

    n_tiles_h = pl.cdiv(h_out, h_tile)
    hp = n_tiles_h * h_tile + halo_h           # pad so every requested block is in-bounds
    pad_top = padding
    pad_bot = hp - h - pad_top                 # >= padding; extras only feed clipped rows
    assert pad_bot >= padding

    # ---- operand preparation (NCHW -> NHWC, bf16, pad, BN folding) -------------------
    x_nhwc = jnp.transpose(x.astype(compute_dtype), (0, 2, 3, 1))
    x_p = jnp.pad(x_nhwc, ((0, 0), (pad_top, pad_bot), (padding, padding), (0, 0)))

    # Fold inference BatchNorm: scale into the weight, bias kept for the epilogue.
    # TODO(synk): training-mode BatchNorm batch statistics are not computed in-kernel;
    #             the inference (running-stats) semantics are implemented.
    scale = bn_gamma.astype(jnp.float32) / jnp.sqrt(bn_var.astype(jnp.float32) + eps)
    bias = (bn_beta.astype(jnp.float32)
            - bn_mean.astype(jnp.float32) * scale).reshape(1, c2)
    w_taps = jnp.transpose(conv_weight, (2, 3, 1, 0)).reshape(taps, c1, c2)
    w_taps = (w_taps.astype(jnp.float32) * scale[None, None, :]).astype(compute_dtype)

    # ---- specs ------------------------------------------------------------------------
    m = (h_tile // halo_h) if halo_h > 0 else 0

    in_specs = [pl.BlockSpec((1, h_tile, wp, c1), lambda b, j: (b, j, 0, 0))]
    inputs = [x_p]
    if halo_h > 0:
        # Halo rows of the window = the `halo_h` rows right below this tile, expressed as
        # a plain blocked view (block height = halo_h, block index (j+1)*h_tile/halo_h).
        in_specs.append(pl.BlockSpec((1, halo_h, wp, c1),
                                     lambda b, j: (b, (j + 1) * m, 0, 0)))
        inputs.append(x_p)
    in_specs += [
        pl.BlockSpec((taps, c1, c2), lambda b, j: (0, 0, 0)),   # weight: VMEM resident
        pl.BlockSpec((1, c2), lambda b, j: (0, 0)),             # bias:   VMEM resident
    ]
    inputs += [w_taps, bias]

    # ---- VMEM limit & cost hint ---------------------------------------------------------
    a_bytes = h_tile * wp * c1 * cs
    b_bytes = halo_h * wp * c1 * cs
    o_bytes = h_tile * w_out * c2 * os_
    w_bytes = taps * c1 * c2 * cs
    scratch_bytes = (h_tile + halo_h) * wp * c1 * cs + h_tile * w_out * c2 * 4
    needed = 2 * (a_bytes + b_bytes + o_bytes + w_bytes + c2 * 4) + scratch_bytes + (2 << 20)
    vmem_limit = int(min(max(needed, 16 << 20), int(0.85 * capacity)))

    cost = pl.CostEstimate(
        flops=2 * n * h_out * w_out * c1 * c2 * taps + 2 * n * h_out * w_out * c2,
        transcendentals=0,
        bytes_accessed=(n * n_tiles_h * (h_tile + halo_h) * wp * c1 * cs
                        + n * h_out * w_out * c2 * os_ + w_bytes + 4 * c2),
    )

    kernel = functools.partial(_aspp_kernel, k_h=k_h, k_w=k_w, dilation=dilation,
                               h_tile=h_tile, w_out=w_out, halo=halo_h)

    out_nhwc = pl.pallas_call(
        kernel,
        out_shape=jax.ShapeDtypeStruct((n, h_out, w_out, c2), out_dtype),
        grid=(n, n_tiles_h),
        in_specs=in_specs,
        out_specs=pl.BlockSpec((1, h_tile, w_out, c2), lambda b, j: (b, j, 0, 0)),
        scratch_shapes=[
            pltpu.VMEM((h_tile + halo_h, wp, c1), compute_dtype),   # input window
            pltpu.VMEM((h_tile * w_out, c2), jnp.float32),          # f32 accumulator
        ],
        compiler_params=pltpu.CompilerParams(
            dimension_semantics=("parallel", "parallel"),
            vmem_limit_bytes=vmem_limit,
        ),
        cost_estimate=cost,
    )(*inputs)

    # Back to the PyTorch NCHW layout.
    return jnp.transpose(out_nhwc, (0, 3, 1, 2))


if __name__ == "__main__":
    key = jax.random.PRNGKey(0)
    kx, kw_key = jax.random.split(key)

    # _ASPPModule(inplanes=4, planes=8, kernel_size=3, padding=2, dilation=2) on a
    # (2, 4, 16, 16) NCHW input.  (Real ASPP widths are where the kernel pays off;
    # these shapes are a small smoke test.)
    N, C1, H, W = 2, 4, 16, 16
    C2, K, DIL, PAD = 8, 3, 2, 2
    EPS = 1e-5

    x = jax.random.normal(kx, (N, C1, H, W), dtype=jnp.float32)
    fan_in = C1 * K * K
    conv_w = jax.random.normal(kw_key, (C2, C1, K, K), dtype=jnp.float32) * math.sqrt(2.0 / fan_in)

    # BatchNorm2d exactly as _init_weight leaves it (gamma=1, beta=0) with fresh running
    # stats (mean=0, var=1), evaluated in inference mode.
    gamma = jnp.ones((C2,), jnp.float32)
    beta = jnp.zeros((C2,), jnp.float32)
    r_mean = jnp.zeros((C2,), jnp.float32)
    r_var = jnp.ones((C2,), jnp.float32)

    out = aspp_forward(x, conv_w, gamma, beta, r_mean, r_var,
                       padding=PAD, dilation=DIL, eps=EPS,
                       h_tile=8)   # force 2 row-tiles so the halo-tiled path is exercised
    out = jax.block_until_ready(out)

    # Reference: XLA dilated conv + folded BN + ReLU in f32.  Tolerance is loosened
    # because the kernel uses bf16 matmul operands (accumulation is still f32).
    ref_conv = jax.lax.conv_general_dilated(
        x, conv_w, window_strides=(1, 1),
        padding=((PAD, PAD), (PAD, PAD)),
        rhs_dilation=(DIL, DIL),
        dimension_numbers=("NCHW", "OIHW", "NCHW"))
    ref_scale = gamma / jnp.sqrt(r_var + EPS)
    ref_bias = beta - r_mean * ref_scale
    ref = jnp.maximum(ref_conv * ref_scale[None, :, None, None]
                      + ref_bias[None, :, None, None], 0.0)

    assert out.shape == ref.shape == (N, C2, H, W)
    err = float(jnp.max(jnp.abs(out - ref)))
    assert jnp.allclose(out, ref, atol=5e-2, rtol=5e-2), err

    print("KERNEL_OK")
</pallas_src>

<mosaic_0001>
module attributes {stable_mosaic.version = 11 : i64} {
  func.func @_aspp_kernel(%arg0: i32, %arg1: i32, %arg2: memref<1x8x20x4xbf16, #tpu.memory_space<vmem>>, %arg3: memref<1x4x20x4xbf16, #tpu.memory_space<vmem>>, %arg4: memref<9x4x8xbf16, #tpu.memory_space<vmem>>, %arg5: memref<1x8xf32, #tpu.memory_space<vmem>>, %arg6: memref<1x8x16x8xf32, #tpu.memory_space<vmem>>, %arg7: memref<12x20x4xbf16, #tpu.memory_space<vmem>>, %arg8: memref<128x8xf32, #tpu.memory_space<vmem>>) attributes {dimension_semantics = [#tpu.dimension_semantics<parallel>, #tpu.dimension_semantics<parallel>], iteration_bounds = array<i64: 2, 2>, scalar_prefetch = 0 : i64, scratch_operands = 2 : i64, tpu.core_type = #tpu.core_type<tc>, window_params = [{transform_indices = @transform_0, window_bounds = array<i64: 1, 8, 20, 4>}, {transform_indices = @transform_1, window_bounds = array<i64: 1, 4, 20, 4>}, {pipeline_mode = #tpu.pipeline_mode<synchronous>, transform_indices = @transform_2, window_bounds = array<i64: 9, 4, 8>}, {pipeline_mode = #tpu.pipeline_mode<synchronous>, transform_indices = @transform_3, window_bounds = array<i64: 1, 8>}, {transform_indices = @transform_4, window_bounds = array<i64: 1, 8, 16, 8>}]} {
    %c0 = arith.constant 0 : index
    %c0_0 = arith.constant 0 : index
    %c0_1 = arith.constant 0 : index
    %c0_2 = arith.constant 0 : index
    %0 = vector.load %arg2[%c0, %c0_0, %c0_1, %c0_2] : memref<1x8x20x4xbf16, #tpu.memory_space<vmem>>, vector<1x8x20x4xbf16>
    %1 = vector.shape_cast %0 : vector<1x8x20x4xbf16> to vector<8x20x4xbf16>
    %c0_3 = arith.constant 0 : index
    %c0_4 = arith.constant 0 : index
    %c0_5 = arith.constant 0 : index
    %2 = vector.load %arg7[%c0_3, %c0_4, %c0_5] : memref<12x20x4xbf16, #tpu.memory_space<vmem>>, vector<8x20x4xbf16>
    tpu.vector_store %arg7[%c0_3, %c0_4, %c0_5], %1 {strides = array<i32>} : memref<12x20x4xbf16, #tpu.memory_space<vmem>>, vector<8x20x4xbf16>,
    %c0_6 = arith.constant 0 : index
    %c0_7 = arith.constant 0 : index
    %c0_8 = arith.constant 0 : index
    %c0_9 = arith.constant 0 : index
    %3 = vector.load %arg3[%c0_6, %c0_7, %c0_8, %c0_9] : memref<1x4x20x4xbf16, #tpu.memory_space<vmem>>, vector<1x4x20x4xbf16>
    %4 = vector.shape_cast %3 : vector<1x4x20x4xbf16> to vector<4x20x4xbf16>
    %c8 = arith.constant 8 : index
    %c0_10 = arith.constant 0 : index
    %c0_11 = arith.constant 0 : index
    %5 = vector.load %arg7[%c8, %c0_10, %c0_11] : memref<12x20x4xbf16, #tpu.memory_space<vmem>>, vector<4x20x4xbf16>
    tpu.vector_store %arg7[%c8, %c0_10, %c0_11], %4 {strides = array<i32>} : memref<12x20x4xbf16, #tpu.memory_space<vmem>>, vector<4x20x4xbf16>,
    %c0_12 = arith.constant 0 : index
    %c0_13 = arith.constant 0 : index
    %c0_14 = arith.constant 0 : index
    %6 = vector.load %arg7[%c0_12, %c0_13, %c0_14] : memref<12x20x4xbf16, #tpu.memory_space<vmem>>, vector<12x16x4xbf16>
    %7 = vector.shape_cast %6 : vector<12x16x4xbf16> to vector<192x4xbf16>
    %8 = vector.extract_strided_slice %7 {offsets = [0, 0], sizes = [128, 4], strides = [1, 1]} : vector<192x4xbf16> to vector<128x4xbf16>
    %c0_15 = arith.constant 0 : index
    %c0_16 = arith.constant 0 : index
    %c0_17 = arith.constant 0 : index
    %9 = vector.load %arg4[%c0_15, %c0_16, %c0_17] : memref<9x4x8xbf16, #tpu.memory_space<vmem>>, vector<1x4x8xbf16>
    %10 = vector.shape_cast %9 : vector<1x4x8xbf16> to vector<4x8xbf16>
    %cst = arith.constant dense<0.000000e+00> : vector<128x8xf32>
    %11 = tpu.matmul %8, %10, %cst {dimension_numbers = #tpu.dot_dimension_numbers<[1], [0], [0], [1], [0, 0, 1, 1], [], []>} : vector<128x4xbf16>, vector<4x8xbf16>, vector<128x8xf32> -> vector<128x8xf32>
    %c0_18 = arith.constant 0 : index
    %c0_19 = arith.constant 0 : index
    %12 = vector.load %arg8[%c0_18, %c0_19] : memref<128x8xf32, #tpu.memory_space<vmem>>, vector<128x8xf32>
    tpu.vector_store %arg8[%c0_18, %c0_19], %11 {strides = array<i32>} : memref<128x8xf32, #tpu.memory_space<vmem>>, vector<128x8xf32>,
    %13 = vector.extract_strided_slice %7 {offsets = [32, 0], sizes = [128, 4], strides = [1, 1]} : vector<192x4xbf16> to vector<128x4xbf16>
    %c3 = arith.constant 3 : index
    %c0_20 = arith.constant 0 : index
    %c0_21 = arith.constant 0 : index
    %14 = vector.load %arg4[%c3, %c0_20, %c0_21] : memref<9x4x8xbf16, #tpu.memory_space<vmem>>, vector<1x4x8xbf16>
    %15 = vector.shape_cast %14 : vector<1x4x8xbf16> to vector<4x8xbf16>
    %cst_22 = arith.constant dense<0.000000e+00> : vector<128x8xf32>
    %16 = tpu.matmul %13, %15, %cst_22 {dimension_numbers = #tpu.dot_dimension_numbers<[1], [0], [0], [1], [0, 0, 1, 1], [], []>} : vector<128x4xbf16>, vector<4x8xbf16>, vector<128x8xf32> -> vector<128x8xf32>
    %c0_23 = arith.constant 0 : index
    %c0_24 = arith.constant 0 : index
    %17 = vector.load %arg8[%c0_23, %c0_24] : memref<128x8xf32, #tpu.memory_space<vmem>>, vector<128x8xf32>
    %18 = arith.addf %17, %16 : vector<128x8xf32>
    %c0_25 = arith.constant 0 : index
    %c0_26 = arith.constant 0 : index
    %19 = vector.load %arg8[%c0_25, %c0_26] : memref<128x8xf32, #tpu.memory_space<vmem>>, vector<128x8xf32>
    tpu.vector_store %arg8[%c0_25, %c0_26], %18 {strides = array<i32>} : memref<128x8xf32, #tpu.memory_space<vmem>>, vector<128x8xf32>,
    %20 = vector.extract_strided_slice %7 {offsets = [64, 0], sizes = [128, 4], strides = [1, 1]} : vector<192x4xbf16> to vector<128x4xbf16>
    %c6 = arith.constant 6 : index
    %c0_27 = arith.constant 0 : index
    %c0_28 = arith.constant 0 : index
    %21 = vector.load %arg4[%c6, %c0_27, %c0_28] : memref<9x4x8xbf16, #tpu.memory_space<vmem>>, vector<1x4x8xbf16>
    %22 = vector.shape_cast %21 : vector<1x4x8xbf16> to vector<4x8xbf16>
    %cst_29 = arith.constant dense<0.000000e+00> : vector<128x8xf32>
    %23 = tpu.matmul %20, %22, %cst_29 {dimension_numbers = #tpu.dot_dimension_numbers<[1], [0], [0], [1], [0, 0, 1, 1], [], []>} : vector<128x4xbf16>, vector<4x8xbf16>, vector<128x8xf32> -> vector<128x8xf32>
    %c0_30 = arith.constant 0 : index
    %c0_31 = arith.constant 0 : index
    %24 = vector.load %arg8[%c0_30, %c0_31] : memref<128x8xf32, #tpu.memory_space<vmem>>, vector<128x8xf32>
    %25 = arith.addf %24, %23 : vector<128x8xf32>
    %c0_32 = arith.constant 0 : index
    %c0_33 = arith.constant 0 : index
    %26 = vector.load %arg8[%c0_32, %c0_33] : memref<128x8xf32, #tpu.memory_space<vmem>>, vector<128x8xf32>
    tpu.vector_store %arg8[%c0_32, %c0_33], %25 {strides = array<i32>} : memref<128x8xf32, #tpu.memory_space<vmem>>, vector<128x8xf32>,
    %c0_34 = arith.constant 0 : index
    %c2 = arith.constant 2 : index
    %c0_35 = arith.constant 0 : index
    %27 = vector.load %arg7[%c0_34, %c2, %c0_35] : memref<12x20x4xbf16, #tpu.memory_space<vmem>>, vector<12x16x4xbf16>
    %28 = vector.shape_cast %27 : vector<12x16x4xbf16> to vector<192x4xbf16>
    %29 = vector.extract_strided_slice %28 {offsets = [0, 0], sizes = [128, 4], strides = [1, 1]} : vector<192x4xbf16> to vector<128x4xbf16>
    %c1 = arith.constant 1 : index
    %c0_36 = arith.constant 0 : index
    %c0_37 = arith.constant 0 : index
    %30 = vector.load %arg4[%c1, %c0_36, %c0_37] : memref<9x4x8xbf16, #tpu.memory_space<vmem>>, vector<1x4x8xbf16>
    %31 = vector.shape_cast %30 : vector<1x4x8xbf16> to vector<4x8xbf16>
    %cst_38 = arith.constant dense<0.000000e+00> : vector<128x8xf32>
    %32 = tpu.matmul %29, %31, %cst_38 {dimension_numbers = #tpu.dot_dimension_numbers<[1], [0], [0], [1], [0, 0, 1, 1], [], []>} : vector<128x4xbf16>, vector<4x8xbf16>, vector<128x8xf32> -> vector<128x8xf32>
    %c0_39 = arith.constant 0 : index
    %c0_40 = arith.constant 0 : index
    %33 = vector.load %arg8[%c0_39, %c0_40] : memref<128x8xf32, #tpu.memory_space<vmem>>, vector<128x8xf32>
    %34 = arith.addf %33, %32 : vector<128x8xf32>
    %c0_41 = arith.constant 0 : index
    %c0_42 = arith.constant 0 : index
    %35 = vector.load %arg8[%c0_41, %c0_42] : memref<128x8xf32, #tpu.memory_space<vmem>>, vector<128x8xf32>
    tpu.vector_store %arg8[%c0_41, %c0_42], %34 {strides = array<i32>} : memref<128x8xf32, #tpu.memory_space<vmem>>, vector<128x8xf32>,
    %36 = vector.extract_strided_slice %28 {offsets = [32, 0], sizes = [128, 4], strides = [1, 1]} : vector<192x4xbf16> to vector<128x4xbf16>
    %c4 = arith.constant 4 : index
    %c0_43 = arith.constant 0 : index
    %c0_44 = arith.constant 0 : index
    %37 = vector.load %arg4[%c4, %c0_43, %c0_44] : memref<9x4x8xbf16, #tpu.memory_space<vmem>>, vector<1x4x8xbf16>
    %38 = vector.shape_cast %37 : vector<1x4x8xbf16> to vector<4x8xbf16>
    %cst_45 = arith.constant dense<0.000000e+00> : vector<128x8xf32>
    %39 = tpu.matmul %36, %38, %cst_45 {dimension_numbers = #tpu.dot_dimension_numbers<[1], [0], [0], [1], [0, 0, 1, 1], [], []>} : vector<128x4xbf16>, vector<4x8xbf16>, vector<128x8xf32> -> vector<128x8xf32>
    %c0_46 = arith.constant 0 : index
    %c0_47 = arith.constant 0 : index
    %40 = vector.load %arg8[%c0_46, %c0_47] : memref<128x8xf32, #tpu.memory_space<vmem>>, vector<128x8xf32>
    %41 = arith.addf %40, %39 : vector<128x8xf32>
    %c0_48 = arith.constant 0 : index
    %c0_49 = arith.constant 0 : index
    %42 = vector.load %arg8[%c0_48, %c0_49] : memref<128x8xf32, #tpu.memory_space<vmem>>, vector<128x8xf32>
    tpu.vector_store %arg8[%c0_48, %c0_49], %41 {strides = array<i32>} : memref<128x8xf32, #tpu.memory_space<vmem>>, vector<128x8xf32>,
    %43 = vector.extract_strided_slice %28 {offsets = [64, 0], sizes = [128, 4], strides = [1, 1]} : vector<192x4xbf16> to vector<128x4xbf16>
    %c7 = arith.constant 7 : index
    %c0_50 = arith.constant 0 : index
    %c0_51 = arith.constant 0 : index
    %44 = vector.load %arg4[%c7, %c0_50, %c0_51] : memref<9x4x8xbf16, #tpu.memory_space<vmem>>, vector<1x4x8xbf16>
    %45 = vector.shape_cast %44 : vector<1x4x8xbf16> to vector<4x8xbf16>
    %cst_52 = arith.constant dense<0.000000e+00> : vector<128x8xf32>
    %46 = tpu.matmul %43, %45, %cst_52 {dimension_numbers = #tpu.dot_dimension_numbers<[1], [0], [0], [1], [0, 0, 1, 1], [], []>} : vector<128x4xbf16>, vector<4x8xbf16>, vector<128x8xf32> -> vector<128x8xf32>
    %c0_53 = arith.constant 0 : index
    %c0_54 = arith.constant 0 : index
    %47 = vector.load %arg8[%c0_53, %c0_54] : memref<128x8xf32, #tpu.memory_space<vmem>>, vector<128x8xf32>
    %48 = arith.addf %47, %46 : vector<128x8xf32>
    %c0_55 = arith.constant 0 : index
    %c0_56 = arith.constant 0 : index
    %49 = vector.load %arg8[%c0_55, %c0_56] : memref<128x8xf32, #tpu.memory_space<vmem>>, vector<128x8xf32>
    tpu.vector_store %arg8[%c0_55, %c0_56], %48 {strides = array<i32>} : memref<128x8xf32, #tpu.memory_space<vmem>>, vector<128x8xf32>,
    %c0_57 = arith.constant 0 : index
    %c4_58 = arith.constant 4 : index
    %c0_59 = arith.constant 0 : index
    %50 = vector.load %arg7[%c0_57, %c4_58, %c0_59] : memref<12x20x4xbf16, #tpu.memory_space<vmem>>, vector<12x16x4xbf16>
    %51 = vector.shape_cast %50 : vector<12x16x4xbf16> to vector<192x4xbf16>
    %52 = vector.extract_strided_slice %51 {offsets = [0, 0], sizes = [128, 4], strides = [1, 1]} : vector<192x4xbf16> to vector<128x4xbf16>
    %c2_60 = arith.constant 2 : index
    %c0_61 = arith.constant 0 : index
    %c0_62 = arith.constant 0 : index
    %53 = vector.load %arg4[%c2_60, %c0_61, %c0_62] : memref<9x4x8xbf16, #tpu.memory_space<vmem>>, vector<1x4x8xbf16>
    %54 = vector.shape_cast %53 : vector<1x4x8xbf16> to vector<4x8xbf16>
    %cst_63 = arith.constant dense<0.000000e+00> : vector<128x8xf32>
    %55 = tpu.matmul %52, %54, %cst_63 {dimension_numbers = #tpu.dot_dimension_numbers<[1], [0], [0], [1], [0, 0, 1, 1], [], []>} : vector<128x4xbf16>, vector<4x8xbf16>, vector<128x8xf32> -> vector<128x8xf32>
    %c0_64 = arith.constant 0 : index
    %c0_65 = arith.constant 0 : index
    %56 = vector.load %arg8[%c0_64, %c0_65] : memref<128x8xf32, #tpu.memory_space<vmem>>, vector<128x8xf32>
    %57 = arith.addf %56, %55 : vector<128x8xf32>
    %c0_66 = arith.constant 0 : index
    %c0_67 = arith.constant 0 : index
    %58 = vector.load %arg8[%c0_66, %c0_67] : memref<128x8xf32, #tpu.memory_space<vmem>>, vector<128x8xf32>
    tpu.vector_store %arg8[%c0_66, %c0_67], %57 {strides = array<i32>} : memref<128x8xf32, #tpu.memory_space<vmem>>, vector<128x8xf32>,
    %59 = vector.extract_strided_slice %51 {offsets = [32, 0], sizes = [128, 4], strides = [1, 1]} : vector<192x4xbf16> to vector<128x4xbf16>
    %c5 = arith.constant 5 : index
    %c0_68 = arith.constant 0 : index
    %c0_69 = arith.constant 0 : index
    %60 = vector.load %arg4[%c5, %c0_68, %c0_69] : memref<9x4x8xbf16, #tpu.memory_space<vmem>>, vector<1x4x8xbf16>
    %61 = vector.shape_cast %60 : vector<1x4x8xbf16> to vector<4x8xbf16>
    %cst_70 = arith.constant dense<0.000000e+00> : vector<128x8xf32>
    %62 = tpu.matmul %59, %61, %cst_70 {dimension_numbers = #tpu.dot_dimension_numbers<[1], [0], [0], [1], [0, 0, 1, 1], [], []>} : vector<128x4xbf16>, vector<4x8xbf16>, vector<128x8xf32> -> vector<128x8xf32>
    %c0_71 = arith.constant 0 : index
    %c0_72 = arith.constant 0 : index
    %63 = vector.load %arg8[%c0_71, %c0_72] : memref<128x8xf32, #tpu.memory_space<vmem>>, vector<128x8xf32>
    %64 = arith.addf %63, %62 : vector<128x8xf32>
    %c0_73 = arith.constant 0 : index
    %c0_74 = arith.constant 0 : index
    %65 = vector.load %arg8[%c0_73, %c0_74] : memref<128x8xf32, #tpu.memory_space<vmem>>, vector<128x8xf32>
    tpu.vector_store %arg8[%c0_73, %c0_74], %64 {strides = array<i32>} : memref<128x8xf32, #tpu.memory_space<vmem>>, vector<128x8xf32>,
    %66 = vector.extract_strided_slice %51 {offsets = [64, 0], sizes = [128, 4], strides = [1, 1]} : vector<192x4xbf16> to vector<128x4xbf16>
    %c8_75 = arith.constant 8 : index
    %c0_76 = arith.constant 0 : index
    %c0_77 = arith.constant 0 : index
    %67 = vector.load %arg4[%c8_75, %c0_76, %c0_77] : memref<9x4x8xbf16, #tpu.memory_space<vmem>>, vector<1x4x8xbf16>
    %68 = vector.shape_cast %67 : vector<1x4x8xbf16> to vector<4x8xbf16>
    %cst_78 = arith.constant dense<0.000000e+00> : vector<128x8xf32>
    %69 = tpu.matmul %66, %68, %cst_78 {dimension_numbers = #tpu.dot_dimension_numbers<[1], [0], [0], [1], [0, 0, 1, 1], [], []>} : vector<128x4xbf16>, vector<4x8xbf16>, vector<128x8xf32> -> vector<128x8xf32>
    %c0_79 = arith.constant 0 : index
    %c0_80 = arith.constant 0 : index
    %70 = vector.load %arg8[%c0_79, %c0_80] : memref<128x8xf32, #tpu.memory_space<vmem>>, vector<128x8xf32>
    %71 = arith.addf %70, %69 : vector<128x8xf32>
    %c0_81 = arith.constant 0 : index
    %c0_82 = arith.constant 0 : index
    %72 = vector.load %arg8[%c0_81, %c0_82] : memref<128x8xf32, #tpu.memory_space<vmem>>, vector<128x8xf32>
    tpu.vector_store %arg8[%c0_81, %c0_82], %71 {strides = array<i32>} : memref<128x8xf32, #tpu.memory_space<vmem>>, vector<128x8xf32>,
    %c0_83 = arith.constant 0 : index
    %c0_84 = arith.constant 0 : index
    %73 = vector.load %arg8[%c0_83, %c0_84] : memref<128x8xf32, #tpu.memory_space<vmem>>, vector<128x8xf32>
    %c0_85 = arith.constant 0 : index
    %c0_86 = arith.constant 0 : index
    %74 = vector.load %arg5[%c0_85, %c0_86] : memref<1x8xf32, #tpu.memory_space<vmem>>, vector<1x8xf32>
    %75 = vector.shape_cast %74 : vector<1x8xf32> to vector<8xf32>
    %76 = vector.shape_cast %75 : vector<8xf32> to vector<1x8xf32>
    %77 = vector.broadcast %76 : vector<1x8xf32> to vector<128x8xf32>
    %78 = arith.addf %73, %77 : vector<128x8xf32>
    %cst_87 = arith.constant 0.000000e+00 : f32
    %79 = vector.broadcast %cst_87 : f32 to vector<128x8xf32>
    %80 = arith.maximumf %78, %79 : vector<128x8xf32>
    %81 = vector.shape_cast %80 : vector<128x8xf32> to vector<8x16x8xf32>
    %c0_88 = arith.constant 0 : index
    %c0_89 = arith.constant 0 : index
    %c0_90 = arith.constant 0 : index
    %c0_91 = arith.constant 0 : index
    %82 = vector.load %arg6[%c0_88, %c0_89, %c0_90, %c0_91] : memref<1x8x16x8xf32, #tpu.memory_space<vmem>>, vector<1x8x16x8xf32>
    %83 = vector.shape_cast %82 : vector<1x8x16x8xf32> to vector<8x16x8xf32>
    %84 = vector.shape_cast %81 : vector<8x16x8xf32> to vector<1x8x16x8xf32>
    tpu.vector_store %arg6[%c0_88, %c0_89, %c0_90, %c0_91], %84 {strides = array<i32>} : memref<1x8x16x8xf32, #tpu.memory_space<vmem>>, vector<1x8x16x8xf32>,
    return
  }
  func.func @transform_0(%arg0: i32, %arg1: i32) -> (i32, i32, i32, i32) {
    %c0_i32 = arith.constant 0 : i32
    %c0_i32_0 = arith.constant 0 : i32
    %c0_i32_1 = arith.constant 0 : i32
    return %arg0, %arg1, %c0_i32, %c0_i32_0 : i32, i32, i32, i32
  }
  func.func @transform_1(%arg0: i32, %arg1: i32) -> (i32, i32, i32, i32) {
    %c1_i32 = arith.constant 1 : i32
    %0 = arith.addi %arg1, %c1_i32 : i32
    %c2_i32 = arith.constant 2 : i32
    %1 = arith.muli %0, %c2_i32 : i32
    %c0_i32 = arith.constant 0 : i32
    %c0_i32_0 = arith.constant 0 : i32
    %c0_i32_1 = arith.constant 0 : i32
    return %arg0, %1, %c0_i32, %c0_i32_0 : i32, i32, i32, i32
  }
  func.func @transform_2(%arg0: i32, %arg1: i32) -> (i32, i32, i32) {
    %c0_i32 = arith.constant 0 : i32
    %c0_i32_0 = arith.constant 0 : i32
    %c0_i32_1 = arith.constant 0 : i32
    %c0_i32_2 = arith.constant 0 : i32
    return %c0_i32, %c0_i32_0, %c0_i32_1 : i32, i32, i32
  }
  func.func @transform_3(%arg0: i32, %arg1: i32) -> (i32, i32) {
    %c0_i32 = arith.constant 0 : i32
    %c0_i32_0 = arith.constant 0 : i32
    %c0_i32_1 = arith.constant 0 : i32
    return %c0_i32, %c0_i32_0 : i32, i32
  }
  func.func @transform_4(%arg0: i32, %arg1: i32) -> (i32, i32, i32, i32) {
    %c0_i32 = arith.constant 0 : i32
    %c0_i32_0 = arith.constant 0 : i32
    %c0_i32_1 = arith.constant 0 : i32
    return %arg0, %arg1, %c0_i32, %c0_i32_0 : i32, i32, i32, i32
  }
}

</mosaic_0001>

<bundles_post_ra>
// kernel: tpu_custom_call.1
= control target key start
LH: loop header
LB: loop body
LE: loop exit
PB: predicated region body
PF: predicated region fallthrough
CT: control target
= control target key end

     0   :  { %s3032_s15 = smov 0   ;;  %s3034_s16 = smov 0   ;;  %s3662_s0 = inlined_call_operand.vmem [shape: bf16[2,20,20,4], index: 0, kind: input, shape index: {}]   ;;  %s3663_s1 = inlined_call_operand.vmem [shape: bf16[2,20,20,4], index: 1, kind: input, shape index: {}]   ;;  %s3664_s2 = inlined_call_operand.vmem [shape: bf16[9,4,8], index: 2, kind: input, shape index: {}]   ;;  %s3665_s3 = inlined_call_operand.vmem [shape: f32[1,8], index: 3, kind: input, shape index: {}]   ;;  %s3666_s4 = inlined_call_operand.vmem [shape: f32[2,16,16,8], index: 4, kind: output, shape index: {}]  }
   0x1   :  { %s3036_s17 = smov 0   ;;  %s3038_s18 = smov 0  }
   0x2   :  { %s3040_s19 = smov 0  }
   0x3 LB: > { %s23_s20 = sadd.s32 1, %s2997_s17  ;;  %s26_s21 = sadd.s32 1, %s3001_s18  ;;  %s3005_s19 = sphi %s3040_s19, %s14_s19   ;;  %s3001_s18 = sphi %s3038_s18, %s3674_s18   ;;  %s2997_s17 = sphi %s3036_s17, %s3673_s17   ;;  %s2993_s16 = sphi %s3034_s16, %s3672_s16   ;;  %s2989_s15 = sphi %s3032_s15, %s3671_s15  }
   0x4   : > { %p24_p0 = scmp.ge.s32.totalorder %s23_s20, 2  ;;  %p2495_p1 = scmp.ge.s32.totalorder %s3005_s19, 1 }
   0x5   : > { %p220_p2 = scmp.lt.s32.totalorder %s3005_s19, 5 }
   0x6   : > { %s3676_s20 = smov (%p24_p0, %s23_s20), 0  ;;  %s3678_s21 = smov (!%p24_p0, %s26_s21), %s3001_s18 }
   0x7   : > { %p221_p3 = pnand %p2495_p1, %p220_p2  ;;  %p28_p4 = scmp.ge.s32.totalorder %s3678_s21, 2 }
   0x8   : > { %v420_v0 = vld [vmem:[%s3664_s2] sm:$0x3] (!%p221_p3)  ;;  %vm486_vm0 = vcmask (!%p221_p3), 1041408   ;;  %s3065_s24 = sshll.u32 (!%p221_p3), %s2989_s15, 3  ;;  %p279_p5 = scmp.lt.s32.totalorder (!%p221_p3), %s2993_s16, 1  ;;  %vm345_vm1 = vcmask (!%p221_p3), 27648  }
   0x9   : > { %s3680_s21 = smov (%p28_p4, %s3678_s21), 0  ;;  %224 = sbr.rel (%p221_p3) target bundleno = 416 (0x1a0), region = 36 }
   0xa   : > { %2903 = vmatprep.subr.msk.bf16.mxu1 (!%p221_p3), %vm486_vm0, %v420_v0  ;;  %v488_v1 = vsel (!%p221_p3), %vm486_vm0, %v420_v0, 0  ;;  %p281_p6 = scmp.lt.s32.totalorder (!%p221_p3), %s3065_s24, 19  ;;  %v3073_v2 = vld [vmem:[%s3664_s2 + $0x6] sm:$0x3] (!%p221_p3)  ;;  %2902 = vmatprep.subr.msk.bf16.mxu0 (!%p221_p3), %vm486_vm0, %v420_v0  ;;  %s2656_s27 = sadd.s32 (!%p221_p3), 8, %s3065_s24  ;;  %vm348_vm2 = vcmask (!%p221_p3), 25600  }
   0xb   : > { %2901 = vmatpush3.bf16.msra.mxu1 (!%p221_p3), %v488_v1  ;;  %2739 = vmatpush3.bf16.msra.mxu0 (!%p221_p3), %v488_v1  ;;  %v3082_v3 = vld [vmem:[%s3664_s2 + $0xc] sm:$0x3] (!%p221_p3)  ;;  %p299_p7 = scmp.lt.s32.totalorder (!%p221_p3), %s2656_s27, 19  ;;  %vm461_vm3 = vcmask (!%p221_p3), 31744   ;;  %v2555_v28 = vld [vmem:[%s3664_s2 + $0x2] sm:$0x3] (!%p221_p3) }
   0xc   : > { %2904 = vmatprep.subr.msk.bf16.mxu1 (!%p221_p3), %vm486_vm0, %v3073_v2  ;;  %2905 = vmatprep.subr.msk.bf16.mxu0 (!%p221_p3), %vm486_vm0, %v3082_v3  ;;  %v623_v30 = vsel (!%p221_p3), %vm486_vm0, %v3073_v2, 0  ;;  %v2572_v32 = vld [vmem:[%s3664_s2 + $0x8] sm:$0x3] (!%p221_p3)  ;;  %v789_v34 = vsel (!%p221_p3), %vm486_vm0, %v3082_v3, 0  ;;  %v1146_v44 = vsel (!%p221_p3), %vm486_vm0, %v2555_v28, 0  ;;  %vm1008_vm4 = vcmask (!%p221_p3), 1042432  }
   0xd   : > { %v3185_v45 = vld [vmem:[%s3664_s2 + $0xe] sm:$0x3] (!%p221_p3)  ;;  %v1308_v46 = vsel (!%p221_p3), %vm486_vm0, %v2572_v32, 0  ;;  %v3193_v47 = vld [vmem:[%s3664_s2 + $0x4] sm:$0x3] (!%p221_p3)  ;;  %vm1009_vm5 = vcmask (!%p221_p3), 1046532  }
   0xe   : > { %vm3218_vm6 = vmor (!%p221_p3), %vm1008_vm4, %vm1009_vm5  ;;  %vm1690_vm7 = vcmask (!%p221_p3), 1045508   ;;  %vm587_vm9 = vcmask (!%p221_p3), 64512   ;;  %p312_p8 = scmp.lt.s32.totalorder (!%p221_p3), %s3065_s24, 15 }
   0xf   : > { %vm3316_vm8 = vmor (!%p221_p3), %vm486_vm0, %vm1690_vm7 }
  0x10   : > { %s3682_s16 = smov (!%p279_p5, %s2993_s16), 1  ;;  %s3684_s27 = smov (!%p299_p7, %s2656_s27), 19 }
  0x11   : > { %s282_s30 = scalar_select %p281_p6, %s3065_s24, 19 }
  0x12   : > { %s2913_s5 = smul.u32 60, %s3682_s16  ;;  %s3686_s24 = smov (!%p312_p8, %s3065_s24), 15 }
  0x13   : > { %s2912_s6 = smul.u32 3, %s282_s30  ;;  %s2502_s11 = sshll.u32 %s3686_s24, 1 }
  0x14   : > { %s2914_s9 = smul.u32 3, %s3684_s27 }
  0x15   : > { %s285_s7 = sadd.s32 %s2913_s5, %s2912_s6 }
  0x16   : > { %s2497_s8 = sshll.u32 %s285_s7, 2  ;;  %s303_s13 = sadd.s32 %s2914_s9, %s2913_s5 }
  0x17   : > { %s3093_s12 = scalar_lea.vmem %s3662_s0, %s2497_s8  ;;  %s2500_s14 = sshll.u32 %s303_s13, 2 }
  0x18   : > { %v333_v4 = vld [vmem:[%s3093_s12 + $0x30] sm:$0xf]  ;;  %v334_v5 = vld [vmem:[%s3093_s12 + $0x34] sm:$0xf]  ;;  %v336_v6 = vld [vmem:[%s3093_s12 + $0x3c] sm:$0xf]  ;;  %s3131_s23 = scalar_lea.vmem %s3663_s1, %s2500_s14 }
  0x19   : > { %359 = vst.msk [vmem:[#allocation2 + $0x30] sm:$0xf] %vm345_vm1, %v333_v4  ;;  %360 = vst.msk [vmem:[#allocation2 + $0x34] sm:$0xf] %vm345_vm1, %v334_v5  ;;  %v337_v7 = vld [vmem:[%s3093_s12 + $0x40] sm:$0xf] }
  0x1a   : > { %362 = vst.msk [vmem:[#allocation2 + $0x3c] sm:$0xf] %vm345_vm1, %v336_v6  ;;  %v321_v8 = vld [vmem:[%s3093_s12] sm:$0xf]  ;;  %v322_v9 = vld [vmem:[%s3093_s12 + $0x4] sm:$0xf] }
  0x1b   : > { %363 = vst.msk [vmem:[#allocation2 + $0x40] sm:$0xf] %vm345_vm1, %v337_v7  ;;  %346 = vst.msk [vmem:[#allocation2] sm:$0xf] %vm345_vm1, %v321_v8  ;;  %v324_v10 = vld [vmem:[%s3093_s12 + $0xc] sm:$0xf] }
  0x1c   : > { %347 = vst.msk [vmem:[#allocation2 + $0x4] sm:$0xf] %vm345_vm1, %v322_v9  ;;  %v325_v11 = vld [vmem:[%s3093_s12 + $0x10] sm:$0xf]  ;;  %v339_v12 = vld [vmem:[%s3093_s12 + $0x48] sm:$0xf] }
  0x1d   : > { %350 = vst.msk [vmem:[#allocation2 + $0xc] sm:$0xf] %vm345_vm1, %v324_v10  ;;  %351 = vst.msk [vmem:[#allocation2 + $0x10] sm:$0xf] %vm345_vm1, %v325_v11  ;;  %v340_v13 = vld [vmem:[%s3093_s12 + $0x4c] sm:$0xf] }
  0x1e   : > { %365 = vst.msk [vmem:[#allocation2 + $0x48] sm:$0xf] %vm345_vm1, %v339_v12  ;;  %v342_v14 = vld [vmem:[%s3093_s12 + $0x54] sm:$0xf]  ;;  %v343_v15 = vld [vmem:[%s3093_s12 + $0x58] sm:$0xf] }
  0x1f   : > { %366 = vst.msk [vmem:[#allocation2 + $0x4c] sm:$0xf] %vm345_vm1, %v340_v13  ;;  %368 = vst.msk [vmem:[#allocation2 + $0x54] sm:$0xf] %vm345_vm1, %v342_v14  ;;  %v327_v16 = vld [vmem:[%s3093_s12 + $0x18] sm:$0xf] }
  0x20   : > { %369 = vst.msk [vmem:[#allocation2 + $0x58] sm:$0xf] %vm345_vm1, %v343_v15  ;;  %v328_v17 = vld [vmem:[%s3093_s12 + $0x1c] sm:$0xf]  ;;  %v330_v18 = vld [vmem:[%s3093_s12 + $0x24] sm:$0xf] }
  0x21   : > { %353 = vst.msk [vmem:[#allocation2 + $0x18] sm:$0xf] %vm345_vm1, %v327_v16  ;;  %354 = vst.msk [vmem:[#allocation2 + $0x1c] sm:$0xf] %vm345_vm1, %v328_v17  ;;  %v331_v19 = vld [vmem:[%s3093_s12 + $0x28] sm:$0xf] }
  0x22   : > { %356 = vst.msk [vmem:[#allocation2 + $0x24] sm:$0xf] %vm345_vm1, %v330_v18  ;;  %v323_v20 = vld [vmem:[%s3093_s12 + $0x8] sm:$0x3]  ;;  %357 = vst.msk [vmem:[#allocation2 + $0x28] sm:$0xf] %vm345_vm1, %v331_v19 }
  0x23   : > { %349 = vst.msk [vmem:[#allocation2 + $0x8] sm:$0x3] %vm348_vm2, %v323_v20  ;;  %v326_v21 = vld [vmem:[%s3093_s12 + $0x14] sm:$0x3]  ;;  %v329_v22 = vld [vmem:[%s3093_s12 + $0x20] sm:$0x3] }
  0x24   : > { %v332_v23 = vld [vmem:[%s3093_s12 + $0x2c] sm:$0x3]  ;;  %v371_v24 = vld [vmem:[%s3131_s23] sm:$0xf]  ;;  %v372_v25 = vld [vmem:[%s3131_s23 + $0x4] sm:$0xf] }
  0x25   : > { %v374_v26 = vld [vmem:[%s3131_s23 + $0xc] sm:$0xf]  ;;  %352 = vst.msk [vmem:[#allocation2 + $0x14] sm:$0x3] %vm348_vm2, %v326_v21  ;;  %355 = vst.msk [vmem:[#allocation2 + $0x20] sm:$0x3] %vm348_vm2, %v329_v22 }
  0x26   : > { %358 = vst.msk [vmem:[#allocation2 + $0x2c] sm:$0x3] %vm348_vm2, %v332_v23  ;;  %v2955_v27 = vld [vmem:[#allocation2 + $0x30] sm:$0xff]   ;;  %v2956_v29 = vld [vmem:[#allocation2 + $0x3c] sm:$0xff]   ;;  %v2959_v35 = vld [vmem:[#allocation2 + $0x48] sm:$0xff]  }
  0x27   : > { %384 = vst.msk [vmem:[#allocation2 + $0x60] sm:$0xf] %vm345_vm1, %v371_v24  ;;  %385 = vst.msk [vmem:[#allocation2 + $0x64] sm:$0xf] %vm345_vm1, %v372_v25  ;;  %2748 = vmatprep.mubr.msk.bf16.mxu1 %vm461_vm3, %v2955_v27  ;;  %v2957_v31 = vld [vmem:[#allocation2] sm:$0xff]   ;;  %v2958_v33 = vld [vmem:[#allocation2 + $0xc] sm:$0xff]  }
  0x28   : > { %387 = vst.msk [vmem:[#allocation2 + $0x6c] sm:$0xf] %vm345_vm1, %v374_v26  ;;  %2749 = vmatmul.mubr.msk.bf16.vlgmr.msra.gmra.mrb[0].mxu1 %vm461_vm3, %v2956_v29  ;;  %2740 = vmatprep.mubr.msk.bf16.mxu0 %vm461_vm3, %v2957_v31  ;;  %v2961_v36 = vld [vmem:[#allocation2 + $0x18] sm:$0xff]   ;;  %v375_v39 = vld [vmem:[%s3131_s23 + $0x10] sm:$0xf] }
  0x29   : > { %2757 = vmatpush3.bf16.msra.mxu1 %v623_v30  ;;  %2741 = vmatmul.mubr.msk.bf16.vlgmr.msra.gmra.mrb[0].mxu0 %vm461_vm3, %v2958_v33  ;;  %v3162_v37 = vld [vmem:[#allocation2 + $0x54] sm:$0xff]   ;;  %v2962_v38 = vld [vmem:[#allocation2 + $0x24] sm:$0xff]   ;;  %388 = vst.msk [vmem:[#allocation2 + $0x70] sm:$0xf] %vm345_vm1, %v375_v39  ;;  %v378_v41 = vld [vmem:[%s3131_s23 + $0x1c] sm:$0xf] }
  0x2a   : > { %2906 = vmatprep.subr.msk.bf16.mxu1 %vm486_vm0, %v2555_v28  ;;  %2752 = vmatprep.mubr.msk.bf16.mxu1 %vm461_vm3, %v2959_v35  ;;  %v377_v40 = vld [vmem:[%s3131_s23 + $0x18] sm:$0xf]  ;;  %v380_v42 = vld [vmem:[%s3131_s23 + $0x24] sm:$0xf]  ;;  %v381_v43 = vld [vmem:[%s3131_s23 + $0x28] sm:$0xf] }
  0x2b   : > { %2775 = vmatpush3.bf16.msra.mxu0 %v789_v34  ;;  %2744 = vmatprep.mubr.msk.bf16.mxu0 %vm461_vm3, %v2961_v36  ;;  %390 = vst.msk [vmem:[#allocation2 + $0x78] sm:$0xf] %vm345_vm1, %v377_v40  ;;  %391 = vst.msk [vmem:[#allocation2 + $0x7c] sm:$0xf] %vm345_vm1, %v378_v41  ;;  %v335_v48 = vld [vmem:[%s3093_s12 + $0x38] sm:$0x3] }
  0x2c   : > { %2907 = vmatprep.subr.msk.bf16.mxu0 %vm486_vm0, %v2572_v32  ;;  %393 = vst.msk [vmem:[#allocation2 + $0x84] sm:$0xf] %vm345_vm1, %v380_v42  ;;  %394 = vst.msk [vmem:[#allocation2 + $0x88] sm:$0xf] %vm345_vm1, %v381_v43  ;;  %v338_v49 = vld [vmem:[%s3093_s12 + $0x44] sm:$0x3] }
  0x2d   : > { %361 = vst.msk [vmem:[#allocation2 + $0x38] sm:$0x3] %vm348_vm2, %v335_v48  ;;  %364 = vst.msk [vmem:[#allocation2 + $0x44] sm:$0x3] %vm348_vm2, %v338_v49  ;;  %v341_v50 = vld [vmem:[%s3093_s12 + $0x50] sm:$0x3] }
  0x2e   : > { %367 = vst.msk [vmem:[#allocation2 + $0x50] sm:$0x3] %vm348_vm2, %v341_v50  ;;  %v344_v51 = vld [vmem:[%s3093_s12 + $0x5c] sm:$0x3]  ;;  %v2963_v52 = vld [vmem:[#allocation2 + $0x60] sm:$0xff]   ;;  %s2503_s12 = sshll.u32 %s3682_s16, 5 }
  0x2f   : > { %370 = vst.msk [vmem:[#allocation2 + $0x5c] sm:$0x3] %vm348_vm2, %v344_v51  ;;  %v937_v53 = vld [vmem:[#allocation2 + $0x4] sm:$0xf]  ;;  %v373_v54 = vld [vmem:[%s3131_s23 + $0x8] sm:$0x3]  ;;  %s3565_s13 = sadd.s32 %s2503_s12, %s2502_s11 }
  0x30   : > { %2753 = vmatmul.mubr.msk.bf16.gmra.mrb[4].mxu1 %vm461_vm3, %v3162_v37  ;;  %386 = vst.msk [vmem:[#allocation2 + $0x68] sm:$0x3] %vm348_vm2, %v373_v54  ;;  %v376_v55 = vld [vmem:[%s3131_s23 + $0x14] sm:$0x3]  ;;  %v943_v56 = vld [vmem:[#allocation2 + $0x1c] sm:$0xf] }
  0x31   : > { %2758 = vmatprep.mubr.msk.bf16.mxu1 %vm461_vm3, %v2961_v36  ;;  %2745 = vmatmul.mubr.msk.bf16.gmra.mrb[4].mxu0 %vm461_vm3, %v2962_v38  ;;  %389 = vst.msk [vmem:[#allocation2 + $0x74] sm:$0x3] %vm348_vm2, %v376_v55  ;;  %v1013_v57 = vrot.slane %v937_v53, 5  ;;  %v936_v58 = vld [vmem:[#allocation2] sm:$0xe]  ;;  %v1027_v60 = vrot.slane %v943_v56, 5 }
  0x32   : > { %2776 = vmatprep.mubr.msk.bf16.mxu0 %vm461_vm3, %v2955_v27  ;;  %v938_v59 = vld [vmem:[#allocation2 + $0x8] sm:$0x1]  ;;  %v942_v61 = vld [vmem:[#allocation2 + $0x18] sm:$0xe]  ;;  %v944_v62 = vld [vmem:[#allocation2 + $0x20] sm:$0x1] }
  0x33   : > { %v2964_v63 = vld [vmem:[#allocation2 + $0x6c] sm:$0xff]   ;;  %v2543_v0 = vrot.slane %v936_v58, 9  ;;  %v1015_v1 = vrot.slane %v1013_v57, 4  ;;  %v1016_v2 = vrot.slane %v938_v59, 5  ;;  %v2965_v4 = vld [vmem:[#allocation2 + $0x78] sm:$0xff]   ;;  %v2545_v6 = vrot.slane %v942_v61, 9 }
  0x34   : > { %v940_v3 = vld [vmem:[#allocation2 + $0x10] sm:$0xf]  ;;  %v1029_v7 = vrot.slane %v1027_v60, 4  ;;  %v1030_v8 = vrot.slane %v944_v62, 5  ;;  %v946_v9 = vld [vmem:[#allocation2 + $0x28] sm:$0xf] }
  0x35   : > { %v939_v10 = vld [vmem:[#allocation2 + $0xc] sm:$0xe]  ;;  %v1020_v11 = vrot.slane %v940_v3, 5  ;;  %v949_v12 = vld [vmem:[#allocation2 + $0x34] sm:$0xf]  ;;  %v1014_v13 = vsel %vm3218_vm6, %v2543_v0, %v1013_v57  ;;  %v1017_v14 = vsel %vm3218_vm6, %v1015_v1, %v1016_v2  ;;  %v1034_v16 = vrot.slane %v946_v9, 5 }
  0x36   : > { %v941_v15 = vld [vmem:[#allocation2 + $0x14] sm:$0x1]  ;;  %v2544_v17 = vrot.slane %v939_v10, 9  ;;  %v1028_v18 = vsel %vm3218_vm6, %v2545_v6, %v1027_v60  ;;  %v1031_v19 = vsel %vm3218_vm6, %v1029_v7, %v1030_v8  ;;  %v945_v20 = vld [vmem:[#allocation2 + $0x24] sm:$0xe]  ;;  %v1041_v22 = vrot.slane %v949_v12, 5 }
  0x37   : > { %v947_v21 = vld [vmem:[#allocation2 + $0x2c] sm:$0x1]  ;;  %v2556_v23 = vcombine.low %v1014_v13, %v1017_v14  ;;  %v1022_v24 = vrot.slane %v1020_v11, 4  ;;  %v1023_v25 = vrot.slane %v941_v15, 5  ;;  %v948_v26 = vld [vmem:[#allocation2 + $0x30] sm:$0xe]  ;;  %v2558_v30 = vcombine.low %v1028_v18, %v1031_v19 }
  0x38   : > { %2759 = vmatmul.mubr.msk.bf16.vlgmr.msra.gmra.mrb[8].mxu1 %vm461_vm3, %v2962_v38  ;;  %v2966_v28 = vld [vmem:[#allocation2 + $0x84] sm:$0xff]   ;;  %v2546_v31 = vrot.slane %v945_v20, 9  ;;  %v1036_v32 = vrot.slane %v1034_v16, 4  ;;  %v1037_v33 = vrot.slane %v947_v21, 5  ;;  %v2547_v34 = vrot.slane %v948_v26, 9  ;;  %s2504_s14 = sshll.u32 %s3565_s13, 3 }
  0x39   : > { %2793 = vmatpush3.bf16.msra.mxu1 %v1146_v44  ;;  %2762 = vmatprep.mubr.msk.bf16.mxu1 %vm461_vm3, %v2955_v27  ;;  %v950_v27 = vld [vmem:[#allocation2 + $0x38] sm:$0x1]  ;;  %v1021_v38 = vsel %vm3218_vm6, %v2544_v17, %v1020_v11  ;;  %v1024_v39 = vsel %vm3218_vm6, %v1022_v24, %v1023_v25  ;;  %v955_v40 = vld [vmem:[#allocation2 + $0x4c] sm:$0xf]  ;;  %v951_v50 = vld [vmem:[#allocation2 + $0x3c] sm:$0xe] }
  0x3a   : > { %2777 = vmatmul.mubr.msk.bf16.vlgmr.msra.gmra.mrb[8].mxu0 %vm461_vm3, %v2956_v29  ;;  %2908 = vmatprep.subr.msk.bf16.mxu1 %vm486_vm0, %v3185_v45  ;;  %v1044_v36 = vrot.slane %v950_v27, 5  ;;  %v382_v41 = vld [vmem:[%s3131_s23 + $0x2c] sm:$0x3]  ;;  %v1035_v42 = vsel %vm3218_vm6, %v2546_v31, %v1034_v16  ;;  %v1038_v43 = vsel %vm3218_vm6, %v1036_v32, %v1037_v33  ;;  %v1042_v48 = vsel %vm3218_vm6, %v2547_v34, %v1041_v22  ;;  %v953_v51 = vld [vmem:[#allocation2 + $0x44] sm:$0x1] }
  0x3b   : > { %2811 = vmatpush3.bf16.msra.mxu0 %v1308_v46  ;;  %2780 = vmatprep.mubr.msk.bf16.mxu0 %vm461_vm3, %v2959_v35  ;;  %395 = vst.msk [vmem:[#allocation2 + $0x8c] sm:$0x3] %vm348_vm2, %v382_v41  ;;  %v2557_v46 = vcombine.low %v1021_v38, %v1024_v39  ;;  %v954_v53 = vld [vmem:[#allocation2 + $0x48] sm:$0xe]  ;;  %v956_v54 = vld [vmem:[#allocation2 + $0x50] sm:$0x1]  ;;  %v2559_v56 = vcombine.low %v1035_v42, %v1038_v43 }
  0x3c   : > { %2909 = vmatprep.subr.msk.bf16.mxu0 %vm486_vm0, %v3193_v47  ;;  %v1470_v55 = vsel %vm486_vm0, %v3185_v45, 0  ;;  %v2548_v58 = vrot.slane %v951_v50, 9  ;;  %v1051_v60 = vrot.slane %v953_v51, 5  ;;  %v3262_v61 = vld [vmem:[%s3664_s2 + $0xa] sm:$0x3]  ;;  %v1827_v62 = vsel %vm486_vm0, %v3193_v47, 0 }
  0x3d   : > { %v1058_v1 = vrot.slane %v956_v54, 5  ;;  %v958_v45 = vld [vmem:[#allocation2 + $0x58] sm:$0xf]  ;;  %v961_v2 = vld [vmem:[#allocation2 + $0x64] sm:$0xf] }
  0x3e   : > { %v3271_v3 = vld [vmem:[%s3664_s2 + $0x10] sm:$0x3]  ;;  %v1062_v6 = vrot.slane %v958_v45, 5  ;;  %v957_v9 = vld [vmem:[#allocation2 + $0x54] sm:$0xe]  ;;  %v1069_v11 = vrot.slane %v961_v2, 5 }
  0x3f   : > { %v959_v10 = vld [vmem:[#allocation2 + $0x5c] sm:$0x1]  ;;  %v960_v12 = vld [vmem:[#allocation2 + $0x60] sm:$0xe]  ;;  %v962_v13 = vld [vmem:[#allocation2 + $0x68] sm:$0x1] }
  0x40   : > { %2763 = vmatmul.mubr.msk.bf16.gmra.mrb[12].mxu1 %vm461_vm3, %v2956_v29  ;;  %v379_v29 = vld [vmem:[%s3131_s23 + $0x20] sm:$0x3]  ;;  %v2550_v16 = vrot.slane %v957_v9, 9  ;;  %v1064_v17 = vrot.slane %v1062_v6, 4  ;;  %v1065_v18 = vrot.slane %v959_v10, 5  ;;  %v2551_v19 = vrot.slane %v960_v12, 9  ;;  %s3582_s23 = scalar_lea.vmem %s3666_s4, %s2504_s14 }
  0x41   : > { %2766 = vmatprep.mubr.msk.bf16.mxu1 %vm461_vm3, %v2959_v35  ;;  %392 = vst.msk [vmem:[#allocation2 + $0x80] sm:$0x3] %vm348_vm2, %v379_v29  ;;  %v1043_v35 = vrot.slane %v1041_v22, 4  ;;  %v1071_v20 = vrot.slane %v1069_v11, 4  ;;  %v1072_v21 = vrot.slane %v962_v13, 5 }
  0x42   : > { %2781 = vmatmul.mubr.msk.bf16.gmra.mrb[12].mxu0 %vm461_vm3, %v3162_v37  ;;  %v964_v22 = vld [vmem:[#allocation2 + $0x70] sm:$0xf]  ;;  %v1063_v24 = vsel %vm3218_vm6, %v2550_v16, %v1062_v6  ;;  %v1066_v25 = vsel %vm3218_vm6, %v1064_v17, %v1065_v18  ;;  %v1070_v27 = vsel %vm3218_vm6, %v2551_v19, %v1069_v11  ;;  %v963_v29 = vld [vmem:[#allocation2 + $0x6c] sm:$0xe]  ;;  %v1617_v32 = vld [vmem:[#allocation2] sm:$0xc] }
  0x43   : > { %2784 = vmatprep.mubr.msk.bf16.mxu0 %vm461_vm3, %v2963_v52  ;;  %v1045_v49 = vsel %vm3218_vm6, %v1043_v35, %v1044_v36  ;;  %v1076_v26 = vrot.slane %v964_v22, 5  ;;  %v1619_v33 = vld [vmem:[#allocation2 + $0x8] sm:$0x3]  ;;  %v3307_v34 = vcombine.low %v1063_v24, %v1066_v25  ;;  %v2552_v36 = vrot.slane %v963_v29, 9  ;;  %v1621_v42 = vld [vmem:[#allocation2 + $0x10] sm:$0xf] }
  0x44   : > { %v3257_v57 = vcombine.low %v1042_v48, %v1045_v49  ;;  %v2594_v39 = vrot.slane %v1617_v32, 10  ;;  %v1697_v41 = vrot.slane %v1619_v33, 6  ;;  %v1701_v49 = vrot.slane %v1621_v42, 6  ;;  %v1627_v2 = vld [vmem:[#allocation2 + $0x28] sm:$0xf] }
  0x45   : > { %v1628_v10 = vld [vmem:[#allocation2 + $0x2c] sm:$0x3]  ;;  %v1629_v12 = vld [vmem:[#allocation2 + $0x30] sm:$0xc]  ;;  %v1631_v13 = vld [vmem:[#allocation2 + $0x38] sm:$0x3] }
  0x46   : > { %v1989_v16 = vsel %vm486_vm0, %v3262_v61, 0  ;;  %v967_v22 = vld [vmem:[#allocation2 + $0x7c] sm:$0xf]  ;;  %v2598_v24 = vrot.slane %v1629_v12, 10  ;;  %v966_v29 = vld [vmem:[#allocation2 + $0x78] sm:$0xe] }
  0x47   : > { %v1632_v33 = vld [vmem:[#allocation2 + $0x3c] sm:$0xc] }
  0x48   : > { %2767 = vmatmul.mubr.msk.bf16.gmra.mrb[16].mxu1 %vm461_vm3, %v3162_v37  ;;  %v952_v37 = vld [vmem:[#allocation2 + $0x40] sm:$0xf] }
  0x49   : > { %2770 = vmatprep.mubr.msk.bf16.mxu1 %vm461_vm3, %v2963_v52  ;;  %v1048_v44 = vrot.slane %v952_v37, 5  ;;  %v1055_v52 = vrot.slane %v955_v40, 5  ;;  %v1078_v37 = vrot.slane %v1076_v26, 4 }
  0x4a   : > { %2785 = vmatmul.mubr.msk.bf16.gmra.mrb[16].mxu0 %vm461_vm3, %v2964_v63 }
  0x4b   : > { %2788 = vmatprep.mubr.msk.bf16.mxu0 %vm461_vm3, %v2965_v4  ;;  %v1050_v59 = vrot.slane %v1048_v44, 4  ;;  %v1057_v0 = vrot.slane %v1055_v52, 4  ;;  %v1049_v47 = vsel %vm3218_vm6, %v2548_v58, %v1048_v44  ;;  %v1624_v44 = vld [vmem:[#allocation2 + $0x1c] sm:$0xf] }
  0x4c   : > { %v1708_v54 = vrot.slane %v1624_v44, 6 }
  0x4d   : > { %v1052_v4 = vsel %vm3218_vm6, %v1050_v59, %v1051_v60  ;;  %v1059_v8 = vsel %vm3218_vm6, %v1057_v0, %v1058_v1 }
  0x4e   : > { %v3288_v14 = vcombine.low %v1049_v47, %v1052_v4  ;;  %v1710_v1 = vrot.slane %v1708_v54, 4  ;;  %v1630_v47 = vld [vmem:[#allocation2 + $0x34] sm:$0xf] }
  0x4f   : > { %v1722_v11 = vrot.slane %v1630_v47, 6  ;;  %v1640_v47 = vld [vmem:[#allocation2 + $0x5c] sm:$0x3] }
  0x50   : > { %2771 = vmatmul.mubr.msk.bf16.gmra.mrb[20].mxu1 %vm461_vm3, %v2964_v63  ;;  %v2549_v63 = vrot.slane %v954_v53, 9  ;;  %v1622_v53 = vld [vmem:[#allocation2 + $0x14] sm:$0x3]  ;;  %v1746_v12 = vrot.slane %v1640_v47, 6 }
  0x51   : > { %2794 = vmatprep.mubr.msk.bf16.mxu1 %vm461_vm3, %v2556_v23  ;;  %v1618_v23 = vld [vmem:[#allocation2 + $0x4] sm:$0xf]  ;;  %v1724_v25 = vrot.slane %v1722_v11, 4 }
  0x52   : > { %2789 = vmatmul.mubr.msk.bf16.gmra.mrb[20].mxu0 %vm461_vm3, %v2966_v28  ;;  %v1056_v7 = vsel %vm3218_vm6, %v2549_v63, %v1055_v52  ;;  %v1073_v28 = vsel %vm3218_vm6, %v1071_v20, %v1072_v21  ;;  %v1694_v31 = vrot.slane %v1618_v23, 6  ;;  %v1620_v52 = vld [vmem:[#allocation2 + $0xc] sm:$0xc]  ;;  %v1704_v63 = vrot.slane %v1622_v53, 6 }
  0x53   : > { %2812 = vmatprep.mubr.msk.bf16.mxu0 %vm461_vm3, %v2558_v30  ;;  %v3290_v15 = vcombine.low %v1056_v7, %v1059_v8  ;;  %v3309_v35 = vcombine.low %v1070_v27, %v1073_v28  ;;  %v2595_v60 = vrot.slane %v1620_v52, 10  ;;  %v1715_v7 = vrot.slane %v1627_v2, 6  ;;  %v1633_v27 = vld [vmem:[#allocation2 + $0x40] sm:$0xf]  ;;  %v1638_v2 = vld [vmem:[#allocation2 + $0x54] sm:$0xc] }
  0x54   : > { %v1696_v40 = vrot.slane %v1694_v31, 4  ;;  %v1695_v50 = vsel %vm3316_vm8, %v2594_v39, %v1694_v31  ;;  %v1718_v21 = vrot.slane %v1628_v10, 6  ;;  %v2151_v23 = vsel %vm486_vm0, %v3271_v3, 0  ;;  %v1637_v39 = vld [vmem:[#allocation2 + $0x50] sm:$0x3] }
  0x55   : > { %v1702_v4 = vsel %vm3316_vm8, %v2595_v60, %v1701_v49  ;;  %v1717_v20 = vrot.slane %v1715_v7, 4  ;;  %v1083_v28 = vrot.slane %v967_v22, 5  ;;  %v1729_v31 = vrot.slane %v1633_v27, 6  ;;  %v1641_v22 = vld [vmem:[#allocation2 + $0x60] sm:$0xc] }
  0x56   : > { %v1698_v51 = vsel %vm3316_vm8, %v1696_v40, %v1697_v41  ;;  %v2553_v41 = vrot.slane %v966_v29, 9  ;;  %v2601_v10 = vrot.slane %v1638_v2, 10  ;;  %v1645_v27 = vld [vmem:[#allocation2 + $0x70] sm:$0xf]  ;;  %v1646_v29 = vld [vmem:[#allocation2 + $0x74] sm:$0x3] }
  0x57   : > { %v2607_v59 = vcombine.low %v1695_v50, %v1698_v51  ;;  %v1085_v42 = vrot.slane %v1083_v28, 4  ;;  %v1731_v50 = vrot.slane %v1729_v31, 4 }
  0x58   : > { %2795 = vmatmul.mubr.msk.bf16.vlgmr.msra.gmra.mrb[24].mxu1 %vm461_vm3, %v2557_v46  ;;  %v1077_v46 = vsel %vm3218_vm6, %v2552_v36, %v1076_v26  ;;  %v1725_v26 = vrot.slane %v1631_v13, 6  ;;  %v1634_v36 = vld [vmem:[#allocation2 + $0x44] sm:$0x3] }
  0x59   : > { %2829 = vmatpush3.bf16.msra.mxu1 %v1470_v55  ;;  %2798 = vmatprep.mubr.msk.bf16.mxu1 %vm461_vm3, %v2558_v30  ;;  %v965_v30 = vld [vmem:[#allocation2 + $0x74] sm:$0x1]  ;;  %v1623_v55 = vld [vmem:[#allocation2 + $0x18] sm:$0xc]  ;;  %v1732_v51 = vrot.slane %v1634_v36, 6 }
  0x5a   : > { %2813 = vmatmul.mubr.msk.bf16.vlgmr.msra.gmra.mrb[24].mxu0 %vm461_vm3, %v2559_v56  ;;  %2910 = vmatprep.subr.msk.bf16.mxu1 %vm486_vm0, %v3262_v61  ;;  %v1079_v38 = vrot.slane %v965_v30, 5  ;;  %v2596_v0 = vrot.slane %v1623_v55, 10  ;;  %v1636_v61 = vld [vmem:[#allocation2 + $0x4c] sm:$0xf]  ;;  %v968_v30 = vld [vmem:[#allocation2 + $0x80] sm:$0x1]  ;;  %v1726_v32 = vsel %vm3316_vm8, %v1724_v25, %v1725_v26 }
  0x5b   : > { %2847 = vmatpush3.bf16.msra.mxu0 %v1827_v62  ;;  %2816 = vmatprep.mubr.msk.bf16.mxu0 %vm461_vm3, %v3257_v57  ;;  %v1703_v62 = vrot.slane %v1701_v49, 4  ;;  %v1086_v44 = vrot.slane %v968_v30, 5  ;;  %v2599_v49 = vrot.slane %v1632_v33, 10  ;;  %v1639_v55 = vld [vmem:[#allocation2 + $0x58] sm:$0xf] }
  0x5c   : > { %2911 = vmatprep.subr.msk.bf16.mxu0 %vm486_vm0, %v3271_v3  ;;  %v1080_v48 = vsel %vm3218_vm6, %v1078_v37, %v1079_v38  ;;  %v1709_v8 = vsel %vm3316_vm8, %v2596_v0, %v1708_v54  ;;  %v1719_v3 = vsel %vm3316_vm8, %v1717_v20, %v1718_v21  ;;  %v1736_v37 = vrot.slane %v1636_v61, 6  ;;  %v1635_v38 = vld [vmem:[#allocation2 + $0x48] sm:$0xc]  ;;  %v1642_v21 = vld [vmem:[#allocation2 + $0x64] sm:$0xf] }
  0x5d   : > { %v3332_v58 = vcombine.low %v1077_v46, %v1080_v48  ;;  %v1705_v6 = vsel %vm3316_vm8, %v1703_v62, %v1704_v63  ;;  %v970_v46 = vld [vmem:[#allocation2 + $0x88] sm:$0xf]  ;;  %v2600_v52 = vrot.slane %v1635_v38, 10  ;;  %v1739_v54 = vrot.slane %v1637_v39, 6  ;;  %v969_v62 = vld [vmem:[#allocation2 + $0x84] sm:$0xe] }
  0x5e   : > { %v2608_v17 = vcombine.low %v1702_v4, %v1705_v6  ;;  %v1738_v53 = vrot.slane %v1736_v37, 4  ;;  %v1087_v60 = vsel %vm3218_vm6, %v1085_v42, %v1086_v44  ;;  %v971_v63 = vld [vmem:[#allocation2 + $0x8c] sm:$0x1]  ;;  %v1733_v0 = vsel %vm3316_vm8, %v1731_v50, %v1732_v51  ;;  %v1648_v61 = vld [vmem:[#allocation2 + $0x7c] sm:$0xf] }
  0x5f   : > { %v2554_v6 = vrot.slane %v969_v62, 9  ;;  %v1750_v5 = vrot.slane %v1642_v21, 6  ;;  %v1764_v30 = vrot.slane %v1648_v61, 6  ;;  %v1650_v50 = vld [vmem:[#allocation2 + $0x84] sm:$0xc] }
  0x60   : > { %2799 = vmatmul.mubr.msk.bf16.gmra.mrb[28].mxu1 %vm461_vm3, %v2559_v56  ;;  %v1625_v56 = vld [vmem:[#allocation2 + $0x20] sm:$0x3]  ;;  %v1652_v51 = vld [vmem:[#allocation2 + $0x8c] sm:$0x3] }
  0x61   : > { %2802 = vmatprep.mubr.msk.bf16.mxu1 %vm461_vm3, %v3257_v57  ;;  %v1711_v45 = vrot.slane %v1625_v56, 6  ;;  %v1090_v56 = vrot.slane %v970_v46, 5  ;;  %v1752_v25 = vrot.slane %v1750_v5, 4  ;;  %v1766_v39 = vrot.slane %v1764_v30, 4 }
  0x62   : > { %2817 = vmatmul.mubr.msk.bf16.gmra.mrb[28].mxu0 %vm461_vm3, %v3288_v14 }
  0x63   : > { %2820 = vmatprep.mubr.msk.bf16.mxu0 %vm461_vm3, %v3290_v15  ;;  %v1712_v9 = vsel %vm3316_vm8, %v1710_v1, %v1711_v45  ;;  %v1737_v1 = vsel %vm3316_vm8, %v2600_v52, %v1736_v37  ;;  %v1740_v45 = vsel %vm3316_vm8, %v1738_v53, %v1739_v54  ;;  %v1091_v13 = vsel %vm3218_vm6, %v2554_v6, %v1090_v56 }
  0x64   : > { %v3351_v18 = vcombine.low %v1709_v8, %v1712_v9  ;;  %v1093_v8 = vrot.slane %v971_v63, 5  ;;  %v1760_v37 = vrot.slane %v1646_v29, 6  ;;  %v2605_v54 = vrot.slane %v1650_v50, 10 }
  0x68   : > { %2803 = vmatmul.mubr.msk.bf16.gmra.mrb[32].mxu1 %vm461_vm3, %v3288_v14 }
  0x69   : > { %2806 = vmatprep.mubr.msk.bf16.mxu1 %vm461_vm3, %v3290_v15 }
  0x6a   : > { %2821 = vmatmul.mubr.msk.bf16.gmra.mrb[32].mxu0 %vm461_vm3, %v3307_v34 }
  0x6b   : > { %2824 = vmatprep.mubr.msk.bf16.mxu0 %vm461_vm3, %v3309_v35 }
  0x70   : > { %2807 = vmatmul.mubr.msk.bf16.gmra.mrb[36].mxu1 %vm461_vm3, %v3307_v34 }
  0x71   : > { %2830 = vmatprep.mubr.msk.bf16.mxu1 %vm461_vm3, %v3257_v57  ;;  %v1626_v57 = vld [vmem:[#allocation2 + $0x24] sm:$0xc] }
  0x72   : > { %2825 = vmatmul.mubr.msk.bf16.gmra.mrb[36].mxu0 %vm461_vm3, %v3332_v58  ;;  %v2597_v19 = vrot.slane %v1626_v57, 10  ;;  %v2613_v57 = vcombine.low %v1737_v1, %v1740_v45 }
  0x73   : > { %2848 = vmatprep.mubr.msk.bf16.mxu0 %vm461_vm3, %v2607_v59  ;;  %v1084_v59 = vsel %vm3218_vm6, %v2553_v41, %v1083_v28  ;;  %v1651_v41 = vld [vmem:[#allocation2 + $0x88] sm:$0xf] }
  0x74   : > { %v2584_v4 = vcombine.low %v1084_v59, %v1087_v60  ;;  %v1771_v46 = vrot.slane %v1651_v41, 6 }
  0x76   : > { %v1772_v59 = vsel %vm3316_vm8, %v2605_v54, %v1771_v46 }
  0x78   : > { %2831 = vmatmul.mubr.msk.bf16.vlgmr.msra.gmra.mrb[40].mxu1 %vm461_vm3, %v3288_v14  ;;  %v1716_v14 = vsel %vm3316_vm8, %v2597_v19, %v1715_v7  ;;  %v1092_v7 = vrot.slane %v1090_v56, 4  ;;  %v1774_v56 = vrot.slane %v1652_v51, 6 }
  0x79   : > { %2865 = vmatpush3.bf16.msra.mxu1 %v1989_v16  ;;  %2834 = vmatprep.mubr.msk.bf16.mxu1 %vm461_vm3, %v3290_v15  ;;  %v1723_v15 = vsel %vm3316_vm8, %v2598_v24, %v1722_v11  ;;  %v2610_v40 = vcombine.low %v1716_v14, %v1719_v3  ;;  %v2602_v24 = vrot.slane %v1641_v22, 10  ;;  %v1644_v3 = vld [vmem:[#allocation2 + $0x6c] sm:$0xc] }
  0x7a   : > { %2849 = vmatmul.mubr.msk.bf16.vlgmr.msra.gmra.mrb[40].mxu0 %vm461_vm3, %v2608_v17  ;;  %v2611_v48 = vcombine.low %v1723_v15, %v1726_v32  ;;  %v1094_v16 = vsel %vm3218_vm6, %v1092_v7, %v1093_v8  ;;  %v1649_v15 = vld [vmem:[#allocation2 + $0x80] sm:$0x3]  ;;  %v2603_v33 = vrot.slane %v1644_v3, 10 }
  0x7b   : > { %2883 = vmatpush3.bf16.msra.mxu0 %v2151_v23  ;;  %2852 = vmatprep.mubr.msk.bf16.mxu0 %vm461_vm3, %v3351_v18  ;;  %v2585_v20 = vcombine.low %v1091_v13, %v1094_v16  ;;  %v1643_v23 = vld [vmem:[#allocation2 + $0x68] sm:$0x3]  ;;  %v1751_v28 = vsel %vm3316_vm8, %v2602_v24, %v1750_v5 }
  0x7c   : > { %v1753_v26 = vrot.slane %v1643_v23, 6 }
  0x7e   : > { %v1754_v14 = vsel %vm3316_vm8, %v1752_v25, %v1753_v26 }
  0x7f   : > { %v2624_v32 = vcombine.low %v1751_v28, %v1754_v14 }
  0x80   : > { %2835 = vmatmul.mubr.msk.bf16.gmra.mrb[44].mxu1 %vm461_vm3, %v3307_v34  ;;  %v1730_v34 = vsel %vm3316_vm8, %v2599_v49, %v1729_v31  ;;  %v1647_v31 = vld [vmem:[#allocation2 + $0x78] sm:$0xc] }
  0x81   : > { %2838 = vmatprep.mubr.msk.bf16.mxu1 %vm461_vm3, %v3309_v35  ;;  %v1743_v35 = vrot.slane %v1639_v55, 6  ;;  %v2612_v9 = vcombine.low %v1730_v34, %v1733_v0  ;;  %v2604_v38 = vrot.slane %v1647_v31, 10  ;;  %v1773_v55 = vrot.slane %v1771_v46, 4 }
  0x82   : > { %2853 = vmatmul.mubr.msk.bf16.gmra.mrb[44].mxu0 %vm461_vm3, %v2610_v40 }
  0x83   : > { %2856 = vmatprep.mubr.msk.bf16.mxu0 %vm461_vm3, %v2611_v48  ;;  %v1745_v11 = vrot.slane %v1743_v35, 4  ;;  %v1744_v17 = vsel %vm3316_vm8, %v2601_v10, %v1743_v35  ;;  %v1775_v60 = vsel %vm3316_vm8, %v1773_v55, %v1774_v56 }
  0x84   : > { %v2636_v62 = vcombine.low %v1772_v59, %v1775_v60 }
  0x85   : > { %v1747_v19 = vsel %vm3316_vm8, %v1745_v11, %v1746_v12 }
  0x88   : > { %2839 = vmatmul.mubr.msk.bf16.gmra.mrb[48].mxu1 %vm461_vm3, %v3332_v58  ;;  %v2614_v58 = vcombine.low %v1744_v17, %v1747_v19 }
  0x89   : > { %2842 = vmatprep.mubr.msk.bf16.mxu1 %vm461_vm3, %v2584_v4 }
  0x8a   : > { %2857 = vmatmul.mubr.msk.bf16.gmra.mrb[48].mxu0 %vm461_vm3, %v2612_v9 }
  0x8b   : > { %2860 = vmatprep.mubr.msk.bf16.mxu0 %vm461_vm3, %v2613_v57 }
  0x90   : > { %2843 = vmatmul.mubr.msk.bf16.gmra.mrb[52].mxu1 %vm461_vm3, %v2585_v20 }
  0x91   : > { %2866 = vmatprep.mubr.msk.bf16.mxu1 %vm461_vm3, %v3351_v18  ;;  %v1757_v18 = vrot.slane %v1645_v27, 6 }
  0x92   : > { %2861 = vmatmul.mubr.msk.bf16.gmra.mrb[52].mxu0 %vm461_vm3, %v2614_v58 }
  0x93   : > { %2884 = vmatprep.mubr.msk.bf16.mxu0 %vm461_vm3, %v2611_v48  ;;  %v1759_v36 = vrot.slane %v1757_v18, 4  ;;  %v1758_v42 = vsel %vm3316_vm8, %v2603_v33, %v1757_v18 }
  0x95   : > { %v1761_v44 = vsel %vm3316_vm8, %v1759_v36, %v1760_v37 }
  0x96   : > { %v2625_v52 = vcombine.low %v1758_v42, %v1761_v44 }
  0x98   : > { %2867 = vmatmul.mubr.msk.bf16.vlgmr.msra.gmra.mrb[56].mxu1 %vm461_vm3, %v2610_v40  ;;  %v1767_v40 = vrot.slane %v1649_v15, 6 }
  0x99   : > { %2870 = vmatprep.mubr.msk.bf16.mxu1 %vm461_vm3, %v2611_v48  ;;  %v1765_v48 = vsel %vm3316_vm8, %v2604_v38, %v1764_v30 }
  0x9a   : > { %2885 = vmatmul.mubr.msk.bf16.vlgmr.msra.gmra.mrb[56].mxu0 %vm461_vm3, %v2612_v9  ;;  %v1768_v49 = vsel %vm3316_vm8, %v1766_v39, %v1767_v40 }
  0x9b   : > { %2888 = vmatprep.mubr.msk.bf16.mxu0 %vm461_vm3, %v2613_v57  ;;  %v2635_v53 = vcombine.low %v1765_v48, %v1768_v49 }
  0xa0   : > { %2871 = vmatmul.mubr.msk.bf16.gmra.mrb[60].mxu1 %vm461_vm3, %v2612_v9 }
  0xa1   : > { %2874 = vmatprep.mubr.msk.bf16.mxu1 %vm461_vm3, %v2613_v57 }
  0xa2   : > { %2889 = vmatmul.mubr.msk.bf16.gmra.mrb[60].mxu0 %vm461_vm3, %v2614_v58 }
  0xa3   : > { %2892 = vmatprep.mubr.msk.bf16.mxu0 %vm461_vm3, %v2624_v32 }
  0xa8   : > { %2875 = vmatmul.mubr.msk.bf16.gmra.mrb[64].mxu1 %vm461_vm3, %v2614_v58 }
  0xa9   : > { %2878 = vmatprep.mubr.msk.bf16.mxu1 %vm461_vm3, %v2624_v32 }
  0xaa   : > { %2893 = vmatmul.mubr.msk.bf16.gmra.mrb[64].mxu0 %vm461_vm3, %v2625_v52 }
  0xab   : > { %2896 = vmatprep.mubr.msk.bf16.mxu0 %vm461_vm3, %v2635_v53 }
  0xb0   : > { %2879 = vmatmul.mubr.msk.bf16.gmra.mrb[68].mxu1 %vm461_vm3, %v2625_v52 }
  0xb2   : > { %2897 = vmatmul.mubr.msk.bf16.gmra.mrb[68].mxu0 %vm461_vm3, %v2636_v62 }
  0xfb   : > { %v2750_v63 = vpop.f32.mrb[0].mxu1 }
  0xfc   : > { %598 = vst.msk [vmem:[#allocation3 + $0x50] sm:$0xff] %vm587_vm9, %v2750_v63  ;;  %v556_v34 = vpop.f32.mrb[1].mxu1  ;;  %v2742_v35 = vpop.f32.mrb[0].mxu0 }
  0xfd   : > { %596 = vst.msk [vmem:[#allocation3 + $0x40] sm:$0xff] %vm587_vm9, %v556_v34  ;;  %v2751_v0 = vpop.f32.mrb[2].mxu1  ;;  %590 = vst.msk [vmem:[#allocation3 + $0x10] sm:$0xff] %vm587_vm9, %v2742_v35  ;;  %v524_v43 = vpop.f32.mrb[1].mxu0 }
  0xfe   : > { %599 = vst.msk [vmem:[#allocation3 + $0x58] sm:$0xff] %vm587_vm9, %v2751_v0  ;;  %v559_v1 = vpop.f32.mrb[3].mxu1  ;;  %588 = vst.msk [vmem:[#allocation3] sm:$0xff] %vm587_vm9, %v524_v43  ;;  %v2743_v45 = vpop.f32.mrb[2].mxu0 }
  0xff   : > { %597 = vst.msk [vmem:[#allocation3 + $0x48] sm:$0xff] %vm587_vm9, %v559_v1  ;;  %591 = vst.msk [vmem:[#allocation3 + $0x18] sm:$0xff] %vm587_vm9, %v2743_v45  ;;  %v527_v2 = vpop.f32.mrb[3].mxu0 }
 0x100   : > { %589 = vst.msk [vmem:[#allocation3 + $0x8] sm:$0xff] %vm587_vm9, %v527_v2 }
 0x103   : > { %v2754_v47 = vpop.f32.mrb[4].mxu1  ;;  %v732_v53 = vld [vmem:[#allocation3 + $0x50] sm:$0xff] }
 0x104   : > { %602 = vst.msk [vmem:[#allocation3 + $0x70] sm:$0xff] %vm587_vm9, %v2754_v47  ;;  %v572_v4 = vpop.f32.mrb[5].mxu1  ;;  %v2746_v7 = vpop.f32.mrb[4].mxu0  ;;  %v724_v11 = vld [vmem:[#allocation3 + $0x10] sm:$0xff]  ;;  %v730_v56 = vld [vmem:[#allocation3 + $0x40] sm:$0xff] }
 0x105   : > { %600 = vst.msk [vmem:[#allocation3 + $0x60] sm:$0xff] %vm587_vm9, %v572_v4  ;;  %v2755_v6 = vpop.f32.mrb[6].mxu1  ;;  %594 = vst.msk [vmem:[#allocation3 + $0x30] sm:$0xff] %vm587_vm9, %v2746_v7  ;;  %v540_v9 = vpop.f32.mrb[5].mxu0  ;;  %v722_v12 = vld [vmem:[#allocation3] sm:$0xff]  ;;  %v733_v63 = vld [vmem:[#allocation3 + $0x58] sm:$0xff] }
 0x106   : > { %603 = vst.msk [vmem:[#allocation3 + $0x78] sm:$0xff] %vm587_vm9, %v2755_v6  ;;  %v575_v8 = vpop.f32.mrb[7].mxu1  ;;  %592 = vst.msk [vmem:[#allocation3 + $0x20] sm:$0xff] %vm587_vm9, %v540_v9  ;;  %v2747_v57 = vpop.f32.mrb[6].mxu0  ;;  %v725_v16 = vld [vmem:[#allocation3 + $0x18] sm:$0xff]  ;;  %v731_v45 = vld [vmem:[#allocation3 + $0x48] sm:$0xff] }
 0x107   : > { %601 = vst.msk [vmem:[#allocation3 + $0x68] sm:$0xff] %vm587_vm9, %v575_v8  ;;  %595 = vst.msk [vmem:[#allocation3 + $0x38] sm:$0xff] %vm587_vm9, %v2747_v57  ;;  %v543_v10 = vpop.f32.mrb[7].mxu0  ;;  %v723_v20 = vld [vmem:[#allocation3 + $0x8] sm:$0xff] }
 0x108   : > { %593 = vst.msk [vmem:[#allocation3 + $0x28] sm:$0xff] %vm587_vm9, %v543_v10 }
 0x10b   : > { %v2760_v13 = vpop.f32.mrb[8].mxu1 }
 0x10c   : > { %v740_v17 = vadd.f32 %v2760_v13, %v724_v11  ;;  %v659_v19 = vpop.f32.mrb[9].mxu1  ;;  %v728_v61 = vld [vmem:[#allocation3 + $0x30] sm:$0xff] }
 0x10d   : > { %v738_v58 = vadd.f32 %v722_v12, %v659_v19  ;;  %v2761_v21 = vpop.f32.mrb[10].mxu1  ;;  %v2778_v5 = vpop.f32.mrb[8].mxu0  ;;  %v726_v18 = vld [vmem:[#allocation3 + $0x20] sm:$0xff]  ;;  %v736_v12 = vld [vmem:[#allocation3 + $0x70] sm:$0xff] }
 0x10e   : > { %756 = vst.msk [vmem:[#allocation3 + $0x10] sm:$0xff] %vm587_vm9, %v740_v17  ;;  %v741_v22 = vadd.f32 %v2761_v21, %v725_v16  ;;  %v662_v23 = vpop.f32.mrb[11].mxu1  ;;  %v825_v24 = vpop.f32.mrb[9].mxu0  ;;  %v729_v14 = vld [vmem:[#allocation3 + $0x38] sm:$0xff]  ;;  %v734_v17 = vld [vmem:[#allocation3 + $0x60] sm:$0xff] }
 0x10f   : > { %754 = vst.msk [vmem:[#allocation3] sm:$0xff] %vm587_vm9, %v738_v58  ;;  %v739_v25 = vadd.f32 %v723_v20, %v662_v23  ;;  %v2779_v26 = vpop.f32.mrb[10].mxu0  ;;  %v727_v30 = vld [vmem:[#allocation3 + $0x28] sm:$0xff]  ;;  %v737_v21 = vld [vmem:[#allocation3 + $0x78] sm:$0xff] }
 0x110   : > { %757 = vst.msk [vmem:[#allocation3 + $0x18] sm:$0xff] %vm587_vm9, %v741_v22  ;;  %v828_v27 = vpop.f32.mrb[11].mxu0 }
 0x111   : > { %755 = vst.msk [vmem:[#allocation3 + $0x8] sm:$0xff] %vm587_vm9, %v739_v25 }
 0x113   : > { %v2764_v28 = vpop.f32.mrb[12].mxu1 }
 0x114   : > { %v744_v3 = vadd.f32 %v2764_v28, %v728_v61  ;;  %v675_v29 = vpop.f32.mrb[13].mxu1 }
 0x115   : > { %v890_v31 = vld [vmem:[#allocation3 + $0x10] sm:$0xff]  ;;  %v742_v15 = vadd.f32 %v726_v18, %v675_v29  ;;  %v2765_v32 = vpop.f32.mrb[14].mxu1  ;;  %v2782_v33 = vpop.f32.mrb[12].mxu0 }
 0x116   : > { %v906_v36 = vadd.f32 %v2778_v5, %v890_v31  ;;  %760 = vst.msk [vmem:[#allocation3 + $0x30] sm:$0xff] %vm587_vm9, %v744_v3  ;;  %v888_v37 = vld [vmem:[#allocation3] sm:$0xff]  ;;  %v745_v38 = vadd.f32 %v2765_v32, %v729_v14  ;;  %v678_v39 = vpop.f32.mrb[15].mxu1  ;;  %v841_v40 = vpop.f32.mrb[13].mxu0 }
 0x117   : > { %v904_v41 = vadd.f32 %v888_v37, %v825_v24  ;;  %758 = vst.msk [vmem:[#allocation3 + $0x20] sm:$0xff] %vm587_vm9, %v742_v15  ;;  %v891_v42 = vld [vmem:[#allocation3 + $0x18] sm:$0xff]  ;;  %v743_v44 = vadd.f32 %v727_v30, %v678_v39  ;;  %v2783_v46 = vpop.f32.mrb[14].mxu0 }
 0x118   : > { %922 = vst.msk [vmem:[#allocation3 + $0x10] sm:$0xff] %vm587_vm9, %v906_v36  ;;  %v907_v48 = vadd.f32 %v2779_v26, %v891_v42  ;;  %761 = vst.msk [vmem:[#allocation3 + $0x38] sm:$0xff] %vm587_vm9, %v745_v38  ;;  %v889_v49 = vld [vmem:[#allocation3 + $0x8] sm:$0xff]  ;;  %v844_v50 = vpop.f32.mrb[15].mxu0 }
 0x119   : > { %920 = vst.msk [vmem:[#allocation3] sm:$0xff] %vm587_vm9, %v904_v41  ;;  %v905_v51 = vadd.f32 %v889_v49, %v828_v27  ;;  %759 = vst.msk [vmem:[#allocation3 + $0x28] sm:$0xff] %vm587_vm9, %v743_v44  ;;  %v735_v26 = vld [vmem:[#allocation3 + $0x68] sm:$0xff] }
 0x11a   : > { %923 = vst.msk [vmem:[#allocation3 + $0x18] sm:$0xff] %vm587_vm9, %v907_v48 }
 0x11b   : > { %921 = vst.msk [vmem:[#allocation3 + $0x8] sm:$0xff] %vm587_vm9, %v905_v51  ;;  %v2768_v52 = vpop.f32.mrb[16].mxu1 }
 0x11c   : > { %v748_v54 = vadd.f32 %v2768_v52, %v732_v53  ;;  %v691_v55 = vpop.f32.mrb[17].mxu1 }
 0x11d   : > { %v894_v59 = vld [vmem:[#allocation3 + $0x30] sm:$0xff]  ;;  %v746_v60 = vadd.f32 %v730_v56, %v691_v55  ;;  %v2769_v62 = vpop.f32.mrb[18].mxu1  ;;  %v2786_v34 = vpop.f32.mrb[16].mxu0 }
 0x11e   : > { %v910_v0 = vadd.f32 %v2782_v33, %v894_v59  ;;  %764 = vst.msk [vmem:[#allocation3 + $0x50] sm:$0xff] %vm587_vm9, %v748_v54  ;;  %v892_v35 = vld [vmem:[#allocation3 + $0x20] sm:$0xff]  ;;  %v749_v1 = vadd.f32 %v2769_v62, %v733_v63  ;;  %v694_v43 = vpop.f32.mrb[19].mxu1  ;;  %v857_v2 = vpop.f32.mrb[17].mxu0 }
 0x11f   : > { %v908_v47 = vadd.f32 %v892_v35, %v841_v40  ;;  %762 = vst.msk [vmem:[#allocation3 + $0x40] sm:$0xff] %vm587_vm9, %v746_v60  ;;  %v895_v4 = vld [vmem:[#allocation3 + $0x38] sm:$0xff]  ;;  %v747_v6 = vadd.f32 %v731_v45, %v694_v43  ;;  %v2787_v7 = vpop.f32.mrb[18].mxu0  ;;  %v1247_v32 = vld [vmem:[#allocation3 + $0x10] sm:$0xff] }
 0x120   : > { %926 = vst.msk [vmem:[#allocation3 + $0x30] sm:$0xff] %vm587_vm9, %v910_v0  ;;  %v911_v8 = vadd.f32 %v2783_v46, %v895_v4  ;;  %765 = vst.msk [vmem:[#allocation3 + $0x58] sm:$0xff] %vm587_vm9, %v749_v1  ;;  %v893_v9 = vld [vmem:[#allocation3 + $0x28] sm:$0xff]  ;;  %v860_v57 = vpop.f32.mrb[19].mxu0  ;;  %v1245_v37 = vld [vmem:[#allocation3] sm:$0xff] }
 0x121   : > { %924 = vst.msk [vmem:[#allocation3 + $0x20] sm:$0xff] %vm587_vm9, %v908_v47  ;;  %v909_v10 = vadd.f32 %v893_v9, %v844_v50  ;;  %763 = vst.msk [vmem:[#allocation3 + $0x48] sm:$0xff] %vm587_vm9, %v747_v6  ;;  %v1248_v41 = vld [vmem:[#allocation3 + $0x18] sm:$0xff] }
 0x122   : > { %927 = vst.msk [vmem:[#allocation3 + $0x38] sm:$0xff] %vm587_vm9, %v911_v8  ;;  %v1246_v50 = vld [vmem:[#allocation3 + $0x8] sm:$0xff] }
 0x123   : > { %925 = vst.msk [vmem:[#allocation3 + $0x28] sm:$0xff] %vm587_vm9, %v909_v10  ;;  %v2772_v11 = vpop.f32.mrb[20].mxu1 }
 0x124   : > { %v752_v13 = vadd.f32 %v2772_v11, %v736_v12  ;;  %v707_v16 = vpop.f32.mrb[21].mxu1 }
 0x125   : > { %v898_v19 = vld [vmem:[#allocation3 + $0x50] sm:$0xff]  ;;  %v750_v20 = vadd.f32 %v734_v17, %v707_v16  ;;  %v2773_v58 = vpop.f32.mrb[22].mxu1  ;;  %v2790_v5 = vpop.f32.mrb[20].mxu0 }
 0x126   : > { %v914_v22 = vadd.f32 %v2786_v34, %v898_v19  ;;  %768 = vst.msk [vmem:[#allocation3 + $0x70] sm:$0xff] %vm587_vm9, %v752_v13  ;;  %v896_v23 = vld [vmem:[#allocation3 + $0x40] sm:$0xff]  ;;  %v753_v24 = vadd.f32 %v2773_v58, %v737_v21  ;;  %v710_v25 = vpop.f32.mrb[23].mxu1  ;;  %v873_v27 = vpop.f32.mrb[21].mxu0 }
 0x127   : > { %v912_v61 = vadd.f32 %v896_v23, %v857_v2  ;;  %766 = vst.msk [vmem:[#allocation3 + $0x60] sm:$0xff] %vm587_vm9, %v750_v20  ;;  %v899_v18 = vld [vmem:[#allocation3 + $0x58] sm:$0xff]  ;;  %v751_v28 = vadd.f32 %v735_v26, %v710_v25  ;;  %v2791_v14 = vpop.f32.mrb[22].mxu0  ;;  %v1251_v34 = vld [vmem:[#allocation3 + $0x30] sm:$0xff] }
 0x128   : > { %930 = vst.msk [vmem:[#allocation3 + $0x50] sm:$0xff] %vm587_vm9, %v914_v22  ;;  %v915_v3 = vadd.f32 %v2787_v7, %v899_v18  ;;  %769 = vst.msk [vmem:[#allocation3 + $0x78] sm:$0xff] %vm587_vm9, %v753_v24  ;;  %v897_v29 = vld [vmem:[#allocation3 + $0x48] sm:$0xff]  ;;  %v876_v30 = vpop.f32.mrb[23].mxu0  ;;  %v1249_v1 = vld [vmem:[#allocation3 + $0x20] sm:$0xff] }
 0x129   : > { %928 = vst.msk [vmem:[#allocation3 + $0x40] sm:$0xff] %vm587_vm9, %v912_v61  ;;  %v913_v31 = vadd.f32 %v897_v29, %v860_v57  ;;  %767 = vst.msk [vmem:[#allocation3 + $0x68] sm:$0xff] %vm587_vm9, %v751_v28  ;;  %v1252_v47 = vld [vmem:[#allocation3 + $0x38] sm:$0xff] }
 0x12a   : > { %931 = vst.msk [vmem:[#allocation3 + $0x58] sm:$0xff] %vm587_vm9, %v915_v3  ;;  %v1250_v57 = vld [vmem:[#allocation3 + $0x28] sm:$0xff] }
 0x12b   : > { %929 = vst.msk [vmem:[#allocation3 + $0x48] sm:$0xff] %vm587_vm9, %v913_v31  ;;  %v2796_v15 = vpop.f32.mrb[24].mxu1 }
 0x12c   : > { %v1263_v33 = vadd.f32 %v2796_v15, %v1247_v32  ;;  %v1182_v36 = vpop.f32.mrb[25].mxu1 }
 0x12d   : > { %v902_v38 = vld [vmem:[#allocation3 + $0x70] sm:$0xff]  ;;  %v1261_v39 = vadd.f32 %v1245_v37, %v1182_v36  ;;  %v2797_v40 = vpop.f32.mrb[26].mxu1  ;;  %v2814_v42 = vpop.f32.mrb[24].mxu0 }
 0x12e   : > { %v918_v44 = vadd.f32 %v2790_v5, %v902_v38  ;;  %v900_v46 = vld [vmem:[#allocation3 + $0x60] sm:$0xff]  ;;  %1279 = vst.msk [vmem:[#allocation3 + $0x10] sm:$0xff] %vm587_vm9, %v1263_v33  ;;  %v1264_v48 = vadd.f32 %v2797_v40, %v1248_v41  ;;  %v1185_v49 = vpop.f32.mrb[27].mxu1  ;;  %v1344_v51 = vpop.f32.mrb[25].mxu0 }
 0x12f   : > { %v916_v52 = vadd.f32 %v900_v46, %v873_v27  ;;  %v903_v53 = vld [vmem:[#allocation3 + $0x78] sm:$0xff]  ;;  %1277 = vst.msk [vmem:[#allocation3] sm:$0xff] %vm587_vm9, %v1261_v39  ;;  %v1262_v54 = vadd.f32 %v1246_v50, %v1185_v49  ;;  %v2815_v55 = vpop.f32.mrb[26].mxu0  ;;  %v1255_v5 = vld [vmem:[#allocation3 + $0x50] sm:$0xff] }
 0x130   : > { %934 = vst.msk [vmem:[#allocation3 + $0x70] sm:$0xff] %vm587_vm9, %v918_v44  ;;  %v919_v56 = vadd.f32 %v2791_v14, %v903_v53  ;;  %v901_v59 = vld [vmem:[#allocation3 + $0x68] sm:$0xff]  ;;  %1280 = vst.msk [vmem:[#allocation3 + $0x18] sm:$0xff] %vm587_vm9, %v1264_v48  ;;  %v1347_v60 = vpop.f32.mrb[27].mxu0  ;;  %v1253_v24 = vld [vmem:[#allocation3 + $0x40] sm:$0xff] }
 0x131   : > { %932 = vst.msk [vmem:[#allocation3 + $0x60] sm:$0xff] %vm587_vm9, %v916_v52  ;;  %v917_v62 = vadd.f32 %v901_v59, %v876_v30  ;;  %1278 = vst.msk [vmem:[#allocation3 + $0x8] sm:$0xff] %vm587_vm9, %v1262_v54  ;;  %v1256_v61 = vld [vmem:[#allocation3 + $0x58] sm:$0xff] }
 0x132   : > { %935 = vst.msk [vmem:[#allocation3 + $0x78] sm:$0xff] %vm587_vm9, %v919_v56  ;;  %v1254_v30 = vld [vmem:[#allocation3 + $0x48] sm:$0xff] }
 0x133   : > { %933 = vst.msk [vmem:[#allocation3 + $0x68] sm:$0xff] %vm587_vm9, %v917_v62  ;;  %v2800_v63 = vpop.f32.mrb[28].mxu1 }
 0x134   : > { %v1267_v0 = vadd.f32 %v2800_v63, %v1251_v34  ;;  %v1198_v35 = vpop.f32.mrb[29].mxu1 }
 0x135   : > { %v1409_v43 = vld [vmem:[#allocation3 + $0x10] sm:$0xff]  ;;  %v1265_v45 = vadd.f32 %v1249_v1, %v1198_v35  ;;  %v2801_v2 = vpop.f32.mrb[30].mxu1  ;;  %v2818_v4 = vpop.f32.mrb[28].mxu0 }
 0x136   : > { %v1425_v6 = vadd.f32 %v2814_v42, %v1409_v43  ;;  %1283 = vst.msk [vmem:[#allocation3 + $0x30] sm:$0xff] %vm587_vm9, %v1267_v0  ;;  %v1407_v7 = vld [vmem:[#allocation3] sm:$0xff]  ;;  %v1268_v8 = vadd.f32 %v2801_v2, %v1252_v47  ;;  %v1201_v9 = vpop.f32.mrb[31].mxu1  ;;  %v1360_v10 = vpop.f32.mrb[29].mxu0 }
 0x137   : > { %v1423_v11 = vadd.f32 %v1407_v7, %v1344_v51  ;;  %1281 = vst.msk [vmem:[#allocation3 + $0x20] sm:$0xff] %vm587_vm9, %v1265_v45  ;;  %v1410_v12 = vld [vmem:[#allocation3 + $0x18] sm:$0xff]  ;;  %v1266_v13 = vadd.f32 %v1250_v57, %v1201_v9  ;;  %v2819_v16 = vpop.f32.mrb[30].mxu0  ;;  %v1259_v42 = vld [vmem:[#allocation3 + $0x70] sm:$0xff] }
 0x138   : > { %1441 = vst.msk [vmem:[#allocation3 + $0x10] sm:$0xff] %vm587_vm9, %v1425_v6  ;;  %v1426_v17 = vadd.f32 %v2815_v55, %v1410_v12  ;;  %1284 = vst.msk [vmem:[#allocation3 + $0x38] sm:$0xff] %vm587_vm9, %v1268_v8  ;;  %v1408_v19 = vld [vmem:[#allocation3 + $0x8] sm:$0xff]  ;;  %v1363_v20 = vpop.f32.mrb[31].mxu0  ;;  %v1257_v48 = vld [vmem:[#allocation3 + $0x60] sm:$0xff] }
 0x139   : > { %1439 = vst.msk [vmem:[#allocation3] sm:$0xff] %vm587_vm9, %v1423_v11  ;;  %v1424_v58 = vadd.f32 %v1408_v19, %v1347_v60  ;;  %1282 = vst.msk [vmem:[#allocation3 + $0x28] sm:$0xff] %vm587_vm9, %v1266_v13  ;;  %v1260_v52 = vld [vmem:[#allocation3 + $0x78] sm:$0xff] }
 0x13a   : > { %1442 = vst.msk [vmem:[#allocation3 + $0x18] sm:$0xff] %vm587_vm9, %v1426_v17  ;;  %v1258_v60 = vld [vmem:[#allocation3 + $0x68] sm:$0xff] }
 0x13b   : > { %1440 = vst.msk [vmem:[#allocation3 + $0x8] sm:$0xff] %vm587_vm9, %v1424_v58  ;;  %v2804_v21 = vpop.f32.mrb[32].mxu1 }
 0x13c   : > { %v1271_v22 = vadd.f32 %v2804_v21, %v1255_v5  ;;  %v1214_v23 = vpop.f32.mrb[33].mxu1 }
 0x13d   : > { %v1413_v25 = vld [vmem:[#allocation3 + $0x30] sm:$0xff]  ;;  %v1269_v26 = vadd.f32 %v1253_v24, %v1214_v23  ;;  %v2805_v27 = vpop.f32.mrb[34].mxu1  ;;  %v2822_v18 = vpop.f32.mrb[32].mxu0 }
 0x13e   : > { %v1429_v28 = vadd.f32 %v2818_v4, %v1413_v25  ;;  %1287 = vst.msk [vmem:[#allocation3 + $0x50] sm:$0xff] %vm587_vm9, %v1271_v22  ;;  %v1411_v14 = vld [vmem:[#allocation3 + $0x20] sm:$0xff]  ;;  %v1272_v3 = vadd.f32 %v2805_v27, %v1256_v61  ;;  %v1217_v29 = vpop.f32.mrb[35].mxu1  ;;  %v1376_v31 = vpop.f32.mrb[33].mxu0 }
 0x13f   : > { %v1427_v15 = vadd.f32 %v1411_v14, %v1360_v10  ;;  %1285 = vst.msk [vmem:[#allocation3 + $0x40] sm:$0xff] %vm587_vm9, %v1269_v26  ;;  %v1414_v32 = vld [vmem:[#allocation3 + $0x38] sm:$0xff]  ;;  %v1270_v33 = vadd.f32 %v1254_v30, %v1217_v29  ;;  %v2823_v36 = vpop.f32.mrb[34].mxu0  ;;  %v1571_v4 = vld [vmem:[#allocation3 + $0x10] sm:$0xff] }
 0x140   : > { %1445 = vst.msk [vmem:[#allocation3 + $0x30] sm:$0xff] %vm587_vm9, %v1429_v28  ;;  %v1430_v37 = vadd.f32 %v2819_v16, %v1414_v32  ;;  %1288 = vst.msk [vmem:[#allocation3 + $0x58] sm:$0xff] %vm587_vm9, %v1272_v3  ;;  %v1412_v38 = vld [vmem:[#allocation3 + $0x28] sm:$0xff]  ;;  %v1379_v39 = vpop.f32.mrb[35].mxu0  ;;  %v1569_v8 = vld [vmem:[#allocation3] sm:$0xff] }
 0x141   : > { %1443 = vst.msk [vmem:[#allocation3 + $0x20] sm:$0xff] %vm587_vm9, %v1427_v15  ;;  %v1428_v40 = vadd.f32 %v1412_v38, %v1363_v20  ;;  %1286 = vst.msk [vmem:[#allocation3 + $0x48] sm:$0xff] %vm587_vm9, %v1270_v33  ;;  %v1572_v11 = vld [vmem:[#allocation3 + $0x18] sm:$0xff] }
 0x142   : > { %1446 = vst.msk [vmem:[#allocation3 + $0x38] sm:$0xff] %vm587_vm9, %v1430_v37  ;;  %v1570_v20 = vld [vmem:[#allocation3 + $0x8] sm:$0xff] }
 0x143   : > { %1444 = vst.msk [vmem:[#allocation3 + $0x28] sm:$0xff] %vm587_vm9, %v1428_v40  ;;  %v2808_v41 = vpop.f32.mrb[36].mxu1 }
 0x144   : > { %v1275_v44 = vadd.f32 %v2808_v41, %v1259_v42  ;;  %v1230_v46 = vpop.f32.mrb[37].mxu1 }
 0x145   : > { %v1417_v49 = vld [vmem:[#allocation3 + $0x50] sm:$0xff]  ;;  %v1273_v50 = vadd.f32 %v1257_v48, %v1230_v46  ;;  %v2809_v51 = vpop.f32.mrb[38].mxu1  ;;  %v2826_v53 = vpop.f32.mrb[36].mxu0 }
 0x146   : > { %v1433_v54 = vadd.f32 %v2822_v18, %v1417_v49  ;;  %1291 = vst.msk [vmem:[#allocation3 + $0x70] sm:$0xff] %vm587_vm9, %v1275_v44  ;;  %v1415_v55 = vld [vmem:[#allocation3 + $0x40] sm:$0xff]  ;;  %v1276_v56 = vadd.f32 %v2809_v51, %v1260_v52  ;;  %v1233_v59 = vpop.f32.mrb[39].mxu1  ;;  %v1392_v62 = vpop.f32.mrb[37].mxu0 }
 0x147   : > { %v1431_v63 = vadd.f32 %v1415_v55, %v1376_v31  ;;  %1289 = vst.msk [vmem:[#allocation3 + $0x60] sm:$0xff] %vm587_vm9, %v1273_v50  ;;  %v1418_v34 = vld [vmem:[#allocation3 + $0x58] sm:$0xff]  ;;  %v1274_v0 = vadd.f32 %v1258_v60, %v1233_v59  ;;  %v2827_v35 = vpop.f32.mrb[38].mxu0  ;;  %v1575_v18 = vld [vmem:[#allocation3 + $0x30] sm:$0xff] }
 0x148   : > { %1449 = vst.msk [vmem:[#allocation3 + $0x50] sm:$0xff] %vm587_vm9, %v1433_v54  ;;  %v1434_v1 = vadd.f32 %v2823_v36, %v1418_v34  ;;  %1292 = vst.msk [vmem:[#allocation3 + $0x78] sm:$0xff] %vm587_vm9, %v1276_v56  ;;  %v1416_v43 = vld [vmem:[#allocation3 + $0x48] sm:$0xff]  ;;  %v1395_v45 = vpop.f32.mrb[39].mxu0  ;;  %v1573_v3 = vld [vmem:[#allocation3 + $0x20] sm:$0xff] }
 0x149   : > { %1447 = vst.msk [vmem:[#allocation3 + $0x40] sm:$0xff] %vm587_vm9, %v1431_v63  ;;  %v1432_v2 = vadd.f32 %v1416_v43, %v1379_v39  ;;  %1290 = vst.msk [vmem:[#allocation3 + $0x68] sm:$0xff] %vm587_vm9, %v1274_v0  ;;  %v1576_v15 = vld [vmem:[#allocation3 + $0x38] sm:$0xff] }
 0x14a   : > { %1450 = vst.msk [vmem:[#allocation3 + $0x58] sm:$0xff] %vm587_vm9, %v1434_v1  ;;  %v1574_v39 = vld [vmem:[#allocation3 + $0x28] sm:$0xff] }
 0x14b   : > { %1448 = vst.msk [vmem:[#allocation3 + $0x48] sm:$0xff] %vm587_vm9, %v1432_v2  ;;  %v2832_v47 = vpop.f32.mrb[40].mxu1 }
 0x14c   : > { %v1587_v6 = vadd.f32 %v2832_v47, %v1571_v4  ;;  %v1506_v7 = vpop.f32.mrb[41].mxu1 }
 0x14d   : > { %v1421_v9 = vld [vmem:[#allocation3 + $0x70] sm:$0xff]  ;;  %v1585_v57 = vadd.f32 %v1569_v8, %v1506_v7  ;;  %v2833_v10 = vpop.f32.mrb[42].mxu1  ;;  %v2850_v12 = vpop.f32.mrb[40].mxu0 }
 0x14e   : > { %v1437_v13 = vadd.f32 %v2826_v53, %v1421_v9  ;;  %v1419_v16 = vld [vmem:[#allocation3 + $0x60] sm:$0xff]  ;;  %1603 = vst.msk [vmem:[#allocation3 + $0x10] sm:$0xff] %vm587_vm9, %v1587_v6  ;;  %v1588_v17 = vadd.f32 %v2833_v10, %v1572_v11  ;;  %v1509_v19 = vpop.f32.mrb[43].mxu1  ;;  %v1863_v58 = vpop.f32.mrb[41].mxu0 }
 0x14f   : > { %v1435_v21 = vadd.f32 %v1419_v16, %v1392_v62  ;;  %v1422_v5 = vld [vmem:[#allocation3 + $0x78] sm:$0xff]  ;;  %1601 = vst.msk [vmem:[#allocation3] sm:$0xff] %vm587_vm9, %v1585_v57  ;;  %v1586_v22 = vadd.f32 %v1570_v20, %v1509_v19  ;;  %v2851_v23 = vpop.f32.mrb[42].mxu0  ;;  %v1579_v53 = vld [vmem:[#allocation3 + $0x50] sm:$0xff] }
 0x150   : > { %1453 = vst.msk [vmem:[#allocation3 + $0x70] sm:$0xff] %vm587_vm9, %v1437_v13  ;;  %v1438_v24 = vadd.f32 %v2827_v35, %v1422_v5  ;;  %v1420_v25 = vld [vmem:[#allocation3 + $0x68] sm:$0xff]  ;;  %1604 = vst.msk [vmem:[#allocation3 + $0x18] sm:$0xff] %vm587_vm9, %v1588_v17  ;;  %v1866_v26 = vpop.f32.mrb[43].mxu0  ;;  %v1577_v56 = vld [vmem:[#allocation3 + $0x40] sm:$0xff] }
 0x151   : > { %1451 = vst.msk [vmem:[#allocation3 + $0x60] sm:$0xff] %vm587_vm9, %v1435_v21  ;;  %v1436_v27 = vadd.f32 %v1420_v25, %v1395_v45  ;;  %1602 = vst.msk [vmem:[#allocation3 + $0x8] sm:$0xff] %vm587_vm9, %v1586_v22  ;;  %v1580_v63 = vld [vmem:[#allocation3 + $0x58] sm:$0xff] }
 0x152   : > { %1454 = vst.msk [vmem:[#allocation3 + $0x78] sm:$0xff] %vm587_vm9, %v1438_v24  ;;  %v1578_v45 = vld [vmem:[#allocation3 + $0x48] sm:$0xff] }
 0x153   : > { %1452 = vst.msk [vmem:[#allocation3 + $0x68] sm:$0xff] %vm587_vm9, %v1436_v27  ;;  %v2836_v61 = vpop.f32.mrb[44].mxu1 }
 0x154   : > { %v1591_v28 = vadd.f32 %v2836_v61, %v1575_v18  ;;  %v1522_v14 = vpop.f32.mrb[45].mxu1 }
 0x155   : > { %v1928_v29 = vld [vmem:[#allocation3 + $0x10] sm:$0xff]  ;;  %v1589_v30 = vadd.f32 %v1573_v3, %v1522_v14  ;;  %v2837_v31 = vpop.f32.mrb[46].mxu1  ;;  %v2854_v32 = vpop.f32.mrb[44].mxu0 }
 0x156   : > { %v1944_v33 = vadd.f32 %v2850_v12, %v1928_v29  ;;  %1607 = vst.msk [vmem:[#allocation3 + $0x30] sm:$0xff] %vm587_vm9, %v1591_v28  ;;  %v1926_v36 = vld [vmem:[#allocation3] sm:$0xff]  ;;  %v1592_v37 = vadd.f32 %v2837_v31, %v1576_v15  ;;  %v1525_v38 = vpop.f32.mrb[47].mxu1  ;;  %v1879_v40 = vpop.f32.mrb[45].mxu0 }
 0x157   : > { %v1942_v41 = vadd.f32 %v1926_v36, %v1863_v58  ;;  %1605 = vst.msk [vmem:[#allocation3 + $0x20] sm:$0xff] %vm587_vm9, %v1589_v30  ;;  %v1929_v42 = vld [vmem:[#allocation3 + $0x18] sm:$0xff]  ;;  %v1590_v44 = vadd.f32 %v1574_v39, %v1525_v38  ;;  %v2855_v46 = vpop.f32.mrb[46].mxu0  ;;  %v1583_v12 = vld [vmem:[#allocation3 + $0x70] sm:$0xff] }
 0x158   : > { %1960 = vst.msk [vmem:[#allocation3 + $0x10] sm:$0xff] %vm587_vm9, %v1944_v33  ;;  %v1945_v48 = vadd.f32 %v2851_v23, %v1929_v42  ;;  %1608 = vst.msk [vmem:[#allocation3 + $0x38] sm:$0xff] %vm587_vm9, %v1592_v37  ;;  %v1927_v49 = vld [vmem:[#allocation3 + $0x8] sm:$0xff]  ;;  %v1882_v50 = vpop.f32.mrb[47].mxu0  ;;  %v1581_v17 = vld [vmem:[#allocation3 + $0x60] sm:$0xff] }
 0x159   : > { %1958 = vst.msk [vmem:[#allocation3] sm:$0xff] %vm587_vm9, %v1942_v41  ;;  %v1943_v51 = vadd.f32 %v1927_v49, %v1866_v26  ;;  %1606 = vst.msk [vmem:[#allocation3 + $0x28] sm:$0xff] %vm587_vm9, %v1590_v44  ;;  %v1584_v21 = vld [vmem:[#allocation3 + $0x78] sm:$0xff] }
 0x15a   : > { %1961 = vst.msk [vmem:[#allocation3 + $0x18] sm:$0xff] %vm587_vm9, %v1945_v48  ;;  %v1582_v26 = vld [vmem:[#allocation3 + $0x68] sm:$0xff] }
 0x15b   : > { %1959 = vst.msk [vmem:[#allocation3 + $0x8] sm:$0xff] %vm587_vm9, %v1943_v51  ;;  %v2840_v52 = vpop.f32.mrb[48].mxu1 }
 0x15c   : > { %v1595_v54 = vadd.f32 %v2840_v52, %v1579_v53  ;;  %v1538_v55 = vpop.f32.mrb[49].mxu1 }
 0x15d   : > { %v1932_v59 = vld [vmem:[#allocation3 + $0x30] sm:$0xff]  ;;  %v1593_v60 = vadd.f32 %v1577_v56, %v1538_v55  ;;  %v2841_v62 = vpop.f32.mrb[50].mxu1  ;;  %v2858_v34 = vpop.f32.mrb[48].mxu0 }
 0x15e   : > { %v1948_v0 = vadd.f32 %v2854_v32, %v1932_v59  ;;  %1611 = vst.msk [vmem:[#allocation3 + $0x50] sm:$0xff] %vm587_vm9, %v1595_v54  ;;  %v1930_v35 = vld [vmem:[#allocation3 + $0x20] sm:$0xff]  ;;  %v1596_v1 = vadd.f32 %v2841_v62, %v1580_v63  ;;  %v1541_v43 = vpop.f32.mrb[51].mxu1  ;;  %v1895_v2 = vpop.f32.mrb[49].mxu0 }
 0x15f   : > { %v1946_v47 = vadd.f32 %v1930_v35, %v1879_v40  ;;  %1609 = vst.msk [vmem:[#allocation3 + $0x40] sm:$0xff] %vm587_vm9, %v1593_v60  ;;  %v1933_v4 = vld [vmem:[#allocation3 + $0x38] sm:$0xff]  ;;  %v1594_v6 = vadd.f32 %v1578_v45, %v1541_v43  ;;  %v2859_v7 = vpop.f32.mrb[50].mxu0  ;;  %v2090_v32 = vld [vmem:[#allocation3 + $0x10] sm:$0xff] }
 0x160   : > { %1964 = vst.msk [vmem:[#allocation3 + $0x30] sm:$0xff] %vm587_vm9, %v1948_v0  ;;  %v1949_v8 = vadd.f32 %v2855_v46, %v1933_v4  ;;  %1612 = vst.msk [vmem:[#allocation3 + $0x58] sm:$0xff] %vm587_vm9, %v1596_v1  ;;  %v1931_v9 = vld [vmem:[#allocation3 + $0x28] sm:$0xff]  ;;  %v1898_v57 = vpop.f32.mrb[51].mxu0  ;;  %v2088_v37 = vld [vmem:[#allocation3] sm:$0xff] }
 0x161   : > { %1962 = vst.msk [vmem:[#allocation3 + $0x20] sm:$0xff] %vm587_vm9, %v1946_v47  ;;  %v1947_v10 = vadd.f32 %v1931_v9, %v1882_v50  ;;  %1610 = vst.msk [vmem:[#allocation3 + $0x48] sm:$0xff] %vm587_vm9, %v1594_v6  ;;  %v2091_v41 = vld [vmem:[#allocation3 + $0x18] sm:$0xff] }
 0x162   : > { %1965 = vst.msk [vmem:[#allocation3 + $0x38] sm:$0xff] %vm587_vm9, %v1949_v8  ;;  %v2089_v50 = vld [vmem:[#allocation3 + $0x8] sm:$0xff] }
 0x163   : > { %1963 = vst.msk [vmem:[#allocation3 + $0x28] sm:$0xff] %vm587_vm9, %v1947_v10  ;;  %v2844_v11 = vpop.f32.mrb[52].mxu1 }
 0x164   : > { %v1599_v13 = vadd.f32 %v2844_v11, %v1583_v12  ;;  %v1554_v16 = vpop.f32.mrb[53].mxu1 }
 0x165   : > { %v1936_v19 = vld [vmem:[#allocation3 + $0x50] sm:$0xff]  ;;  %v1597_v20 = vadd.f32 %v1581_v17, %v1554_v16  ;;  %v2845_v58 = vpop.f32.mrb[54].mxu1  ;;  %v2862_v5 = vpop.f32.mrb[52].mxu0 }
 0x166   : > { %v1952_v22 = vadd.f32 %v2858_v34, %v1936_v19  ;;  %1615 = vst.msk [vmem:[#allocation3 + $0x70] sm:$0xff] %vm587_vm9, %v1599_v13  ;;  %v1934_v23 = vld [vmem:[#allocation3 + $0x40] sm:$0xff]  ;;  %v1600_v24 = vadd.f32 %v2845_v58, %v1584_v21  ;;  %v1557_v25 = vpop.f32.mrb[55].mxu1  ;;  %v1911_v27 = vpop.f32.mrb[53].mxu0 }
 0x167   : > { %v1950_v61 = vadd.f32 %v1934_v23, %v1895_v2  ;;  %1613 = vst.msk [vmem:[#allocation3 + $0x60] sm:$0xff] %vm587_vm9, %v1597_v20  ;;  %v1937_v18 = vld [vmem:[#allocation3 + $0x58] sm:$0xff]  ;;  %v1598_v28 = vadd.f32 %v1582_v26, %v1557_v25  ;;  %v2863_v14 = vpop.f32.mrb[54].mxu0  ;;  %v2094_v34 = vld [vmem:[#allocation3 + $0x30] sm:$0xff] }
 0x168   : > { %1968 = vst.msk [vmem:[#allocation3 + $0x50] sm:$0xff] %vm587_vm9, %v1952_v22  ;;  %v1953_v3 = vadd.f32 %v2859_v7, %v1937_v18  ;;  %1616 = vst.msk [vmem:[#allocation3 + $0x78] sm:$0xff] %vm587_vm9, %v1600_v24  ;;  %v1935_v29 = vld [vmem:[#allocation3 + $0x48] sm:$0xff]  ;;  %v1914_v30 = vpop.f32.mrb[55].mxu0  ;;  %v2092_v1 = vld [vmem:[#allocation3 + $0x20] sm:$0xff] }
 0x169   : > { %1966 = vst.msk [vmem:[#allocation3 + $0x40] sm:$0xff] %vm587_vm9, %v1950_v61  ;;  %v1951_v31 = vadd.f32 %v1935_v29, %v1898_v57  ;;  %1614 = vst.msk [vmem:[#allocation3 + $0x68] sm:$0xff] %vm587_vm9, %v1598_v28  ;;  %v2095_v47 = vld [vmem:[#allocation3 + $0x38] sm:$0xff]  ;;  %v3571_v25 = vld [vmem:[%s3665_s3] ss:$0 sm:$0xff] }
 0x16a   : > { %1969 = vst.msk [vmem:[#allocation3 + $0x58] sm:$0xff] %vm587_vm9, %v1953_v3  ;;  %v2093_v57 = vld [vmem:[#allocation3 + $0x28] sm:$0xff] }
 0x16b   : > { %1967 = vst.msk [vmem:[#allocation3 + $0x48] sm:$0xff] %vm587_vm9, %v1951_v31  ;;  %v2868_v15 = vpop.f32.mrb[56].mxu1 }
 0x16c   : > { %v2106_v33 = vadd.f32 %v2868_v15, %v2090_v32  ;;  %v2025_v36 = vpop.f32.mrb[57].mxu1 }
 0x16d   : > { %v1940_v38 = vld [vmem:[#allocation3 + $0x70] sm:$0xff]  ;;  %v2104_v39 = vadd.f32 %v2088_v37, %v2025_v36  ;;  %v2869_v40 = vpop.f32.mrb[58].mxu1  ;;  %v2886_v42 = vpop.f32.mrb[56].mxu0 }
 0x16e   : > { %v1956_v44 = vadd.f32 %v2862_v5, %v1940_v38  ;;  %v1938_v46 = vld [vmem:[#allocation3 + $0x60] sm:$0xff]  ;;  %2122 = vst.msk [vmem:[#allocation3 + $0x10] sm:$0xff] %vm587_vm9, %v2106_v33  ;;  %v2107_v48 = vadd.f32 %v2869_v40, %v2091_v41  ;;  %v2028_v49 = vpop.f32.mrb[59].mxu1  ;;  %v2187_v51 = vpop.f32.mrb[57].mxu0 }
 0x16f   : > { %v1954_v52 = vadd.f32 %v1938_v46, %v1911_v27  ;;  %v1941_v53 = vld [vmem:[#allocation3 + $0x78] sm:$0xff]  ;;  %2120 = vst.msk [vmem:[#allocation3] sm:$0xff] %vm587_vm9, %v2104_v39  ;;  %v2105_v54 = vadd.f32 %v2089_v50, %v2028_v49  ;;  %v2887_v55 = vpop.f32.mrb[58].mxu0  ;;  %v2098_v5 = vld [vmem:[#allocation3 + $0x50] sm:$0xff] }
 0x170   : > { %1972 = vst.msk [vmem:[#allocation3 + $0x70] sm:$0xff] %vm587_vm9, %v1956_v44  ;;  %v1957_v56 = vadd.f32 %v2863_v14, %v1941_v53  ;;  %v1939_v59 = vld [vmem:[#allocation3 + $0x68] sm:$0xff]  ;;  %2123 = vst.msk [vmem:[#allocation3 + $0x18] sm:$0xff] %vm587_vm9, %v2107_v48  ;;  %v2190_v60 = vpop.f32.mrb[59].mxu0  ;;  %v2096_v24 = vld [vmem:[#allocation3 + $0x40] sm:$0xff] }
 0x171   : > { %1970 = vst.msk [vmem:[#allocation3 + $0x60] sm:$0xff] %vm587_vm9, %v1954_v52  ;;  %v1955_v62 = vadd.f32 %v1939_v59, %v1914_v30  ;;  %2121 = vst.msk [vmem:[#allocation3 + $0x8] sm:$0xff] %vm587_vm9, %v2105_v54  ;;  %v2099_v18 = vld [vmem:[#allocation3 + $0x58] sm:$0xff] }
 0x172   : > { %1973 = vst.msk [vmem:[#allocation3 + $0x78] sm:$0xff] %vm587_vm9, %v1957_v56  ;;  %v2097_v31 = vld [vmem:[#allocation3 + $0x48] sm:$0xff] }
 0x173   : > { %1971 = vst.msk [vmem:[#allocation3 + $0x68] sm:$0xff] %vm587_vm9, %v1955_v62  ;;  %v2872_v63 = vpop.f32.mrb[60].mxu1 }
 0x174   : > { %v2110_v0 = vadd.f32 %v2872_v63, %v2094_v34  ;;  %v2041_v35 = vpop.f32.mrb[61].mxu1 }
 0x175   : > { %v2252_v43 = vld [vmem:[#allocation3 + $0x10] sm:$0xff]  ;;  %v2108_v45 = vadd.f32 %v2092_v1, %v2041_v35  ;;  %v2873_v2 = vpop.f32.mrb[62].mxu1  ;;  %v2890_v4 = vpop.f32.mrb[60].mxu0 }
 0x176   : > { %v2268_v6 = vadd.f32 %v2886_v42, %v2252_v43  ;;  %2126 = vst.msk [vmem:[#allocation3 + $0x30] sm:$0xff] %vm587_vm9, %v2110_v0  ;;  %v2250_v7 = vld [vmem:[#allocation3] sm:$0xff]  ;;  %v2111_v8 = vadd.f32 %v2873_v2, %v2095_v47  ;;  %v2044_v9 = vpop.f32.mrb[63].mxu1  ;;  %v2203_v10 = vpop.f32.mrb[61].mxu0 }
 0x177   : > { %v2266_v11 = vadd.f32 %v2250_v7, %v2187_v51  ;;  %2124 = vst.msk [vmem:[#allocation3 + $0x20] sm:$0xff] %vm587_vm9, %v2108_v45  ;;  %v2253_v12 = vld [vmem:[#allocation3 + $0x18] sm:$0xff]  ;;  %v2109_v13 = vadd.f32 %v2093_v57, %v2044_v9  ;;  %v2891_v16 = vpop.f32.mrb[62].mxu0  ;;  %v2102_v56 = vld [vmem:[#allocation3 + $0x70] sm:$0xff] }
 0x178   : > { %2284 = vst.msk [vmem:[#allocation3 + $0x10] sm:$0xff] %vm587_vm9, %v2268_v6  ;;  %v2269_v17 = vadd.f32 %v2887_v55, %v2253_v12  ;;  %2127 = vst.msk [vmem:[#allocation3 + $0x38] sm:$0xff] %vm587_vm9, %v2111_v8  ;;  %v2251_v19 = vld [vmem:[#allocation3 + $0x8] sm:$0xff]  ;;  %v2206_v20 = vpop.f32.mrb[63].mxu0  ;;  %v2100_v63 = vld [vmem:[#allocation3 + $0x60] sm:$0xff] }
 0x179   : > { %2282 = vst.msk [vmem:[#allocation3] sm:$0xff] %vm587_vm9, %v2266_v11  ;;  %v2267_v58 = vadd.f32 %v2251_v19, %v2190_v60  ;;  %2125 = vst.msk [vmem:[#allocation3 + $0x28] sm:$0xff] %vm587_vm9, %v2109_v13  ;;  %v2103_v43 = vld [vmem:[#allocation3 + $0x78] sm:$0xff] }
 0x17a   : > { %2285 = vst.msk [vmem:[#allocation3 + $0x18] sm:$0xff] %vm587_vm9, %v2269_v17  ;;  %v2101_v7 = vld [vmem:[#allocation3 + $0x68] sm:$0xff] }
 0x17b   : > { %2283 = vst.msk [vmem:[#allocation3 + $0x8] sm:$0xff] %vm587_vm9, %v2267_v58  ;;  %v2876_v21 = vpop.f32.mrb[64].mxu1 }
 0x17c   : > { %v2114_v22 = vadd.f32 %v2876_v21, %v2098_v5  ;;  %v2057_v23 = vpop.f32.mrb[65].mxu1 }
 0x17d   : > { %v2256_v26 = vld [vmem:[#allocation3 + $0x30] sm:$0xff]  ;;  %v2112_v27 = vadd.f32 %v2096_v24, %v2057_v23  ;;  %v2877_v61 = vpop.f32.mrb[66].mxu1  ;;  %v2894_v28 = vpop.f32.mrb[64].mxu0 }
 0x17e   : > { %v2272_v14 = vadd.f32 %v2890_v4, %v2256_v26  ;;  %2130 = vst.msk [vmem:[#allocation3 + $0x50] sm:$0xff] %vm587_vm9, %v2114_v22  ;;  %v2254_v3 = vld [vmem:[#allocation3 + $0x20] sm:$0xff]  ;;  %v2115_v29 = vadd.f32 %v2877_v61, %v2099_v18  ;;  %v2060_v30 = vpop.f32.mrb[67].mxu1  ;;  %v2219_v15 = vpop.f32.mrb[65].mxu0 }
 0x17f   : > { %v2300_v32 = vld [vmem:[#allocation3 + $0x10] sm:$0xff]  ;;  %v2270_v33 = vadd.f32 %v2254_v3, %v2203_v10  ;;  %2128 = vst.msk [vmem:[#allocation3 + $0x40] sm:$0xff] %vm587_vm9, %v2112_v27  ;;  %v2257_v36 = vld [vmem:[#allocation3 + $0x38] sm:$0xff]  ;;  %v2113_v37 = vadd.f32 %v2097_v31, %v2060_v30  ;;  %v2895_v38 = vpop.f32.mrb[66].mxu0 }
 0x180   : > { %v2323_v39 = vadd.f32 %v3571_v25, %v2300_v32  ;;  %v2298_v40 = vld [vmem:[#allocation3] sm:$0xff]  ;;  %2288 = vst.msk [vmem:[#allocation3 + $0x30] sm:$0xff] %vm587_vm9, %v2272_v14  ;;  %v2273_v41 = vadd.f32 %v2891_v16, %v2257_v36  ;;  %2131 = vst.msk [vmem:[#allocation3 + $0x58] sm:$0xff] %vm587_vm9, %v2115_v29  ;;  %v2255_v42 = vld [vmem:[#allocation3 + $0x28] sm:$0xff]  ;;  %v2222_v44 = vpop.f32.mrb[67].mxu0 }
 0x181   : > { %v2321_v46 = vadd.f32 %v3571_v25, %v2298_v40  ;;  %v2301_v48 = vld [vmem:[#allocation3 + $0x18] sm:$0xff]  ;;  %2286 = vst.msk [vmem:[#allocation3 + $0x20] sm:$0xff] %vm587_vm9, %v2270_v33  ;;  %v2271_v49 = vadd.f32 %v2255_v42, %v2206_v20  ;;  %2129 = vst.msk [vmem:[#allocation3 + $0x48] sm:$0xff] %vm587_vm9, %v2113_v37 }
 0x182   : > { %v2339_v50 = vmax.f32 %v2323_v39, 0.0  ;;  %v2324_v51 = vadd.f32 %v3571_v25, %v2301_v48  ;;  %v2299_v52 = vld [vmem:[#allocation3 + $0x8] sm:$0xff]  ;;  %2289 = vst.msk [vmem:[#allocation3 + $0x38] sm:$0xff] %vm587_vm9, %v2273_v41 }
 0x183   : > { %v2337_v53 = vmax.f32 %v2321_v46, 0.0  ;;  %v2322_v54 = vadd.f32 %v3571_v25, %v2299_v52  ;;  %2287 = vst.msk [vmem:[#allocation3 + $0x28] sm:$0xff] %vm587_vm9, %v2271_v49  ;;  %v2880_v55 = vpop.f32.mrb[68].mxu1 }
 0x184   : > { %2355 = vst.msk [vmem:[%s3582_s23 + $0x10] sm:$0xff] %vm587_vm9, %v2339_v50  ;;  %v2340_v59 = vmax.f32 %v2324_v51, 0.0  ;;  %v2118_v60 = vadd.f32 %v2880_v55, %v2102_v56  ;;  %v2073_v62 = vpop.f32.mrb[69].mxu1 }
 0x185   : > { %2353 = vst.msk [vmem:[%s3582_s23] sm:$0xff] %vm587_vm9, %v2337_v53  ;;  %v2338_v34 = vmax.f32 %v2322_v54, 0.0  ;;  %v2260_v0 = vld [vmem:[#allocation3 + $0x50] sm:$0xff]  ;;  %v2116_v35 = vadd.f32 %v2100_v63, %v2073_v62  ;;  %v2881_v1 = vpop.f32.mrb[70].mxu1  ;;  %v2898_v45 = vpop.f32.mrb[68].mxu0 }
 0x186   : > { %2356 = vst.msk [vmem:[%s3582_s23 + $0x18] sm:$0xff] %vm587_vm9, %v2340_v59  ;;  %v2276_v2 = vadd.f32 %v2894_v28, %v2260_v0  ;;  %2134 = vst.msk [vmem:[#allocation3 + $0x70] sm:$0xff] %vm587_vm9, %v2118_v60  ;;  %v2258_v47 = vld [vmem:[#allocation3 + $0x40] sm:$0xff]  ;;  %v2119_v4 = vadd.f32 %v2881_v1, %v2103_v43  ;;  %v2076_v6 = vpop.f32.mrb[71].mxu1  ;;  %v2235_v8 = vpop.f32.mrb[69].mxu0 }
 0x187   : > { %2354 = vst.msk [vmem:[%s3582_s23 + $0x8] sm:$0xff] %vm587_vm9, %v2338_v34  ;;  %v2304_v9 = vld [vmem:[#allocation3 + $0x30] sm:$0xff]  ;;  %v2274_v57 = vadd.f32 %v2258_v47, %v2219_v15  ;;  %2132 = vst.msk [vmem:[#allocation3 + $0x60] sm:$0xff] %vm587_vm9, %v2116_v35  ;;  %v2261_v10 = vld [vmem:[#allocation3 + $0x58] sm:$0xff]  ;;  %v2117_v11 = vadd.f32 %v2101_v7, %v2076_v6  ;;  %v2899_v12 = vpop.f32.mrb[70].mxu0 }
 0x188   : > { %v2327_v13 = vadd.f32 %v3571_v25, %v2304_v9  ;;  %v2302_v16 = vld [vmem:[#allocation3 + $0x20] sm:$0xff]  ;;  %2292 = vst.msk [vmem:[#allocation3 + $0x50] sm:$0xff] %vm587_vm9, %v2276_v2  ;;  %v2277_v17 = vadd.f32 %v2895_v38, %v2261_v10  ;;  %2135 = vst.msk [vmem:[#allocation3 + $0x78] sm:$0xff] %vm587_vm9, %v2119_v4  ;;  %v2259_v19 = vld [vmem:[#allocation3 + $0x48] sm:$0xff]  ;;  %v2238_v20 = vpop.f32.mrb[71].mxu0 }
 0x189   : > { %v2325_v58 = vadd.f32 %v3571_v25, %v2302_v16  ;;  %v2305_v21 = vld [vmem:[#allocation3 + $0x38] sm:$0xff]  ;;  %2290 = vst.msk [vmem:[#allocation3 + $0x40] sm:$0xff] %vm587_vm9, %v2274_v57  ;;  %v2275_v5 = vadd.f32 %v2259_v19, %v2222_v44  ;;  %2133 = vst.msk [vmem:[#allocation3 + $0x68] sm:$0xff] %vm587_vm9, %v2117_v11 }
 0x18a   : > { %v2343_v22 = vmax.f32 %v2327_v13, 0.0  ;;  %v2328_v23 = vadd.f32 %v3571_v25, %v2305_v21  ;;  %v2303_v24 = vld [vmem:[#allocation3 + $0x28] sm:$0xff]  ;;  %2293 = vst.msk [vmem:[#allocation3 + $0x58] sm:$0xff] %vm587_vm9, %v2277_v17 }
 0x18b   : > { %v2341_v26 = vmax.f32 %v2325_v58, 0.0  ;;  %v2326_v27 = vadd.f32 %v3571_v25, %v2303_v24  ;;  %2291 = vst.msk [vmem:[#allocation3 + $0x48] sm:$0xff] %vm587_vm9, %v2275_v5 }
 0x18c   : > { %2359 = vst.msk [vmem:[%s3582_s23 + $0x30] sm:$0xff] %vm587_vm9, %v2343_v22  ;;  %v2344_v61 = vmax.f32 %v2328_v23, 0.0 }
 0x18d   : > { %2357 = vst.msk [vmem:[%s3582_s23 + $0x20] sm:$0xff] %vm587_vm9, %v2341_v26  ;;  %v2342_v18 = vmax.f32 %v2326_v27, 0.0  ;;  %v2264_v28 = vld [vmem:[#allocation3 + $0x70] sm:$0xff] }
 0x18e   : > { %2360 = vst.msk [vmem:[%s3582_s23 + $0x38] sm:$0xff] %vm587_vm9, %v2344_v61  ;;  %v2280_v14 = vadd.f32 %v2898_v45, %v2264_v28  ;;  %v2262_v3 = vld [vmem:[#allocation3 + $0x60] sm:$0xff] }
 0x18f   : > { %2358 = vst.msk [vmem:[%s3582_s23 + $0x28] sm:$0xff] %vm587_vm9, %v2342_v18  ;;  %v2308_v29 = vld [vmem:[#allocation3 + $0x50] sm:$0xff]  ;;  %v2278_v30 = vadd.f32 %v2262_v3, %v2235_v8  ;;  %v2265_v31 = vld [vmem:[#allocation3 + $0x78] sm:$0xff] }
 0x190   : > { %v2331_v15 = vadd.f32 %v3571_v25, %v2308_v29  ;;  %v2306_v32 = vld [vmem:[#allocation3 + $0x40] sm:$0xff]  ;;  %2296 = vst.msk [vmem:[#allocation3 + $0x70] sm:$0xff] %vm587_vm9, %v2280_v14  ;;  %v2281_v33 = vadd.f32 %v2899_v12, %v2265_v31  ;;  %v2263_v36 = vld [vmem:[#allocation3 + $0x68] sm:$0xff] }
 0x191   : > { %v2329_v37 = vadd.f32 %v3571_v25, %v2306_v32  ;;  %v2309_v38 = vld [vmem:[#allocation3 + $0x58] sm:$0xff]  ;;  %2294 = vst.msk [vmem:[#allocation3 + $0x60] sm:$0xff] %vm587_vm9, %v2278_v30  ;;  %v2279_v39 = vadd.f32 %v2263_v36, %v2238_v20 }
 0x192   : > { %v2347_v40 = vmax.f32 %v2331_v15, 0.0  ;;  %v2332_v41 = vadd.f32 %v3571_v25, %v2309_v38  ;;  %v2307_v42 = vld [vmem:[#allocation3 + $0x48] sm:$0xff]  ;;  %2297 = vst.msk [vmem:[#allocation3 + $0x78] sm:$0xff] %vm587_vm9, %v2281_v33 }
 0x193   : > { %v2345_v44 = vmax.f32 %v2329_v37, 0.0  ;;  %v2330_v46 = vadd.f32 %v3571_v25, %v2307_v42  ;;  %2295 = vst.msk [vmem:[#allocation3 + $0x68] sm:$0xff] %vm587_vm9, %v2279_v39 }
 0x194   : > { %2363 = vst.msk [vmem:[%s3582_s23 + $0x50] sm:$0xff] %vm587_vm9, %v2347_v40  ;;  %v2348_v48 = vmax.f32 %v2332_v41, 0.0 }
 0x195   : > { %2361 = vst.msk [vmem:[%s3582_s23 + $0x40] sm:$0xff] %vm587_vm9, %v2345_v44  ;;  %v2346_v49 = vmax.f32 %v2330_v46, 0.0 }
 0x196   : > { %2364 = vst.msk [vmem:[%s3582_s23 + $0x58] sm:$0xff] %vm587_vm9, %v2348_v48 }
 0x197   : > { %2362 = vst.msk [vmem:[%s3582_s23 + $0x48] sm:$0xff] %vm587_vm9, %v2346_v49  ;;  %v2312_v50 = vld [vmem:[#allocation3 + $0x70] sm:$0xff] }
 0x198   : > { %v2335_v51 = vadd.f32 %v3571_v25, %v2312_v50  ;;  %v2310_v52 = vld [vmem:[#allocation3 + $0x60] sm:$0xff] }
 0x199   : > { %v2333_v53 = vadd.f32 %v3571_v25, %v2310_v52  ;;  %v2313_v54 = vld [vmem:[#allocation3 + $0x78] sm:$0xff] }
 0x19a   : > { %v2351_v55 = vmax.f32 %v2335_v51, 0.0  ;;  %v2336_v56 = vadd.f32 %v3571_v25, %v2313_v54  ;;  %v2311_v59 = vld [vmem:[#allocation3 + $0x68] sm:$0xff] }
 0x19b   : > { %v2349_v60 = vmax.f32 %v2333_v53, 0.0  ;;  %v2334_v62 = vadd.f32 %v3571_v25, %v2311_v59 }
 0x19c   : > { %2367 = vst.msk [vmem:[%s3582_s23 + $0x70] sm:$0xff] %vm587_vm9, %v2351_v55  ;;  %v2352_v63 = vmax.f32 %v2336_v56, 0.0 }
 0x19d   : > { %2365 = vst.msk [vmem:[%s3582_s23 + $0x60] sm:$0xff] %vm587_vm9, %v2349_v60  ;;  %v2350_v34 = vmax.f32 %v2334_v62, 0.0 }
 0x19e   : > { %2368 = vst.msk [vmem:[%s3582_s23 + $0x78] sm:$0xff] %vm587_vm9, %v2352_v63 }
 0x19f   : > { %2366 = vst.msk [vmem:[%s3582_s23 + $0x68] sm:$0xff] %vm587_vm9, %v2350_v34 }
 0x1a0 PF: > { %s14_s19 = sadd.s32 1, %s3005_s19   ;;  %s3671_s15 = smov %s2997_s17 }
 0x1a1   : > { %p11_p9 = scmp.ge.s32.totalorder %s14_s19, 6   ;;  %s3672_s16 = smov %s3001_s18 }
 0x1a2   : > { %s3673_s17 = smov %s3676_s20  ;;  %s3674_s18 = smov %s3680_s21 }
 0x1a3   :  { %13 = sbr.rel (!%p11_p9) target bundleno = 3 (0x3), region = 78 }

</bundles_post_ra>
